<compile_context>
chip_gen: v6e
topology: v6e:2x2x1
jax: 0.10.0
libtpu: 0.0.40
codegen_flags: <defaults>
</compile_context>

<pallas_src>
import functools

import jax
import jax.numpy as jnp
from jax.experimental import pallas as pl
from jax.experimental.pallas import tpu as pltpu


def _round_up(v, m):
    return (v + m - 1) // m * m


def _lane_tile(x, n):
    """Repeat x n times along the last dim (out[:, j*In + i] = x[:, i]).

    Uses doubling 2-D concats only (no reshape), which lower to a handful of lane
    rotations + copies on TPU.
    """
    if n == 1:
        return x
    width = x.shape[-1]
    out, reps = x, 1
    while reps * 2 <= n:
        out = jnp.concatenate([out, out], axis=-1)
        reps *= 2
    if reps < n:
        out = jnp.concatenate([out, out[:, : (n - reps) * width]], axis=-1)
    return out


# ----------------------------- Pallas kernel --------------------------------
def _kan_fused_kernel(x_ref, *refs, layer_meta):
    """Fused multi-layer KAN forward for one batch tile.

    Per-layer constant refs (in order):
        g_lo  (1, (M-1)*In)   g[j],   j = 0..M-2
        g_hi  (1, (M-1)*In)   g[j+1]
        for k = 1..S:  gr_k, r1_k, r2_k  each (1, (M-1-k)*In)
            gr_k = g[j+k+1], r1_k = 1/(g[j+k]-g[j]), r2_k = 1/(g[j+k+1]-g[j+1])
        w     ((C+1)*In, Out) bf16, rows = [spline (coeff-major, feat-minor) ; base_w^T]
    followed by the single output ref.
    layer_meta: tuple of (M, In, C, S) per layer (static python ints).
    """
    o_ref = refs[-1]
    consts = refs[:-1]

    x = x_ref[...].astype(jnp.float32)                        # (TB, In_0)
    off = 0
    for (M, In, C, S) in layer_meta:
        g_lo = consts[off][...]                               # (1, (M-1)*In)
        g_hi = consts[off + 1][...]
        lvl = consts[off + 2: off + 2 + 3 * S]
        w_ref = consts[off + 2 + 3 * S]
        off += 3 + 3 * S

        # Base activation: SiLU via stable tanh-form sigmoid (EUP slot).
        silu = x * (0.5 * jnp.tanh(0.5 * x) + 0.5)            # (TB, In)

        # Lane-packed slab: column j*In + i  <->  (knot j, feature i).
        x_rep = _lane_tile(x, M - 1)                          # (TB, (M-1)*In)

        # Order-0 indicator:  g[j] <= x < g[j+1]
        b = jnp.where((x_rep >= g_lo) & (x_rep < g_hi), 1.0, 0.0)

        # Cox-de Boor recursion: one fused full-width update per level (no divides).
        for k in range(1, S + 1):
            W = (M - 1 - k) * In
            gr = lvl[3 * (k - 1)][...]
            r1 = lvl[3 * (k - 1) + 1][...]
            r2 = lvl[3 * (k - 1) + 2][...]
            xw = x_rep[:, :W]                                 # prefix slice: no lane shift
            left = (xw - g_lo[:, :W]) * r1 * b[:, :W]
            right = (gr - xw) * r2 * b[:, In:In + W]          # single lane shift by In
            b = left + right                                  # width -> C*In at k == S

        # Single fused MXU matmul: [bases | silu] @ [spline ; base]; bf16 ops, f32 acc.
        lhs = jnp.concatenate([b, silu], axis=-1).astype(jnp.bfloat16)
        x = jnp.dot(lhs, w_ref[...], preferred_element_type=jnp.float32)

    o_ref[...] = x


# --------------------------- wrapper / layer prep ----------------------------
def _prep_layer(gT, bw_t, sw, spline_order, pad_out_to=None):
    """Build kernel-side constants for one layer.

    gT   : (M, In)       knots (knot index major, feature minor)  == grid.T
    bw_t : (In, Out)     base_weight^T
    sw   : (C, In, Out)  scaled spline weight, coefficient-major
    """
    M, In = gT.shape
    C, _, Out = sw.shape
    # Repeated knots would make the reciprocals Inf (same failure mode as torch's
    # runtime divide); fail fast at setup time.
    assert bool(jnp.all(gT[1:] > gT[:-1])), "knots must be strictly increasing"

    def flat(rows):                                           # (n, In) -> (1, n*In)
        return jnp.reshape(rows, (1, -1)).astype(jnp.float32)

    consts = [flat(gT[:-1]), flat(gT[1:])]                    # g_lo, g_hi
    for k in range(1, spline_order + 1):
        nj = M - 1 - k
        consts.append(flat(gT[k + 1:k + 1 + nj]))                          # g[j+k+1]
        consts.append(flat(1.0 / (gT[k:k + nj] - gT[:nj])))                # 1/(g[j+k]-g[j])
        consts.append(flat(1.0 / (gT[k + 1:k + 1 + nj] - gT[1:1 + nj])))   # 1/(g[j+k+1]-g[j+1])

    # Fused weight: rows c*In + i -> spline coeff c / feature i, then In base rows.
    w_spline = jnp.reshape(sw, (C * In, Out))
    w_fused = jnp.concatenate([w_spline, bw_t], axis=0)       # ((C+1)*In, Out)
    if pad_out_to is not None and pad_out_to > Out:
        w_fused = jnp.pad(w_fused, ((0, 0), (0, pad_out_to - Out)))
    consts.append(w_fused.astype(jnp.bfloat16))               # bf16: native MXU path
    return consts, (M, In, C, spline_order)


def _pick_tile_b(B):
    if B <= 8:
        return 8
    # >=2 grid steps when B allows it (v7x: 2 TCs via "parallel"); cap at 512
    # (v6e/v7x 256-row MXU); always a multiple of 8.
    return max(8, min(512, _round_up(-(-B // 2), 8)))


def kan_forward(x, params, spline_order=3, tile_b=None):
    """Fused multi-layer KAN forward. x: (B, In_0) float."""
    B, In0 = x.shape
    Out_last = params[-1][1].shape[1]
    Out_pad = _round_up(Out_last, 128)                        # lane-dense output store

    if tile_b is None:
        tile_b = _pick_tile_b(B)
    tile_b = max(8, _round_up(min(tile_b, _round_up(B, 8)), 8))
    B_pad = _round_up(B, tile_b)
    if B_pad != B:
        x = jnp.pad(x, ((0, B_pad - B), (0, 0)))

    prepped, meta = [], []
    for idx, lp in enumerate(params):
        pad = Out_pad if idx == len(params) - 1 else None
        cs, mt = _prep_layer(*lp, spline_order, pad_out_to=pad)
        prepped.append(cs)
        meta.append(mt)
    flat_consts = [a for cs in prepped for a in cs]

    in_specs = [pl.BlockSpec((tile_b, In0), lambda i: (i, 0))]
    for a in flat_consts:
        # Constant index_map -> fetched once, stays resident in VMEM across the grid.
        # TODO(synk): pipeline_mode=pl.Buffered(1) would single-buffer these on v7x.
        in_specs.append(pl.BlockSpec(a.shape, lambda i: (0, 0)))

    kern = functools.partial(_kan_fused_kernel, layer_meta=tuple(meta))

    out = pl.pallas_call(
        kern,
        out_shape=jax.ShapeDtypeStruct((B_pad, Out_pad), jnp.float32),
        grid=(B_pad // tile_b,),
        in_specs=in_specs,
        out_specs=pl.BlockSpec((tile_b, Out_pad), lambda i: (i, 0)),
        compiler_params=pltpu.CompilerParams(
            dimension_semantics=("parallel",),
            vmem_limit_bytes=48 * 1024 * 1024,                # safe on v5e/v6e/v7x
        ),
    )(x.astype(jnp.float32), *flat_consts)
    return out[:B, :Out_last]


# -------------------------- parameter construction --------------------------
def init_kan_params(key, layers_hidden, grid_size=5, spline_order=3,
                    grid_range=(-1.0, 1.0), scale_base=1.0, scale_spline=1.0):
    """Deterministic synthetic init (shapes match KANLinear; not a checkpoint)."""
    h = (grid_range[1] - grid_range[0]) / grid_size
    knots = (jnp.arange(-spline_order, grid_size + spline_order + 1, dtype=jnp.float32)
             * h + grid_range[0])                             # (M,)
    params = []
    for fin, fout in zip(layers_hidden, layers_hidden[1:]):
        key, k1, k2, k3 = jax.random.split(key, 4)
        gT = jnp.tile(knots[:, None], (1, fin))               # (M, In) == grid.T
        bound_b = (6.0 / ((1.0 + 5.0 * scale_base ** 2) * fin)) ** 0.5
        base_w = jax.random.uniform(k1, (fout, fin), jnp.float32, -bound_b, bound_b)
        C = grid_size + spline_order
        spline_w = jax.random.uniform(k2, (fout, fin, C), jnp.float32, -0.1, 0.1)
        bound_s = (6.0 / ((1.0 + 5.0 * scale_spline ** 2) * fin)) ** 0.5
        spline_scaler = jax.random.uniform(k3, (fout, fin), jnp.float32, -bound_s, bound_s)
        scaled_sw = spline_w * spline_scaler[..., None]       # (Out, In, C) standalone scale
        sw_kernel = jnp.transpose(scaled_sw, (2, 1, 0))       # (C, In, Out) coeff-major
        params.append((gT, jnp.transpose(base_w), sw_kernel))
    return params


# ----------------------------- pure-JAX reference ----------------------------
def _ref_b_splines(x, grid, spline_order):
    # grid: (In, M); mirrors KANLinear.b_splines exactly.
    xe = x[:, :, None]
    bases = ((xe >= grid[:, :-1]) & (xe < grid[:, 1:])).astype(x.dtype)
    for k in range(1, spline_order + 1):
        bases = ((xe - grid[:, :-(k + 1)]) / (grid[:, k:-1] - grid[:, :-(k + 1)]) * bases[..., :-1]
                 + (grid[:, k + 1:] - xe) / (grid[:, k + 1:] - grid[:, 1:-k]) * bases[..., 1:])
    return bases


def _ref_forward(x, params, spline_order):
    for gT, bw_t, sw in params:
        grid = jnp.transpose(gT)                              # (In, M)
        base = jax.nn.silu(x) @ bw_t                          # (B, Out)
        bases = _ref_b_splines(x, grid, spline_order)         # (B, In, C)
        spline = jnp.einsum("bic,cio->bo", bases, sw)         # == flattened F.linear
        x = base + spline
    return x


# ---------------------------------- main -------------------------------------
if __name__ == "__main__":
    layers_hidden = [16, 32, 8]
    batch = 8
    grid_size, spline_order = 5, 3

    key = jax.random.PRNGKey(0)
    kx, kp = jax.random.split(key)
    x = jax.random.uniform(kx, (batch, layers_hidden[0]), jnp.float32, -1.0, 1.0)
    params = init_kan_params(kp, layers_hidden, grid_size=grid_size,
                             spline_order=spline_order)

    out = kan_forward(x, params, spline_order=spline_order)
    out = jax.block_until_ready(out)

    ref = _ref_forward(x, params, spline_order)
    assert out.shape == (batch, layers_hidden[-1])
    # bf16 MXU operands (f32 accumulation): tolerance loosened vs the all-f32 path.
    assert jnp.allclose(out, ref, atol=3e-2, rtol=3e-2), "mismatch vs reference"

    print("KERNEL_OK")
</pallas_src>

<mosaic_0001>
module attributes {stable_mosaic.version = 11 : i64} {
  func.func @_kan_fused_kernel(%arg0: i32, %arg1: memref<8x16xf32, #tpu.memory_space<vmem>>, %arg2: memref<1x176xf32, #tpu.memory_space<vmem>>, %arg3: memref<1x176xf32, #tpu.memory_space<vmem>>, %arg4: memref<1x160xf32, #tpu.memory_space<vmem>>, %arg5: memref<1x160xf32, #tpu.memory_space<vmem>>, %arg6: memref<1x160xf32, #tpu.memory_space<vmem>>, %arg7: memref<1x144xf32, #tpu.memory_space<vmem>>, %arg8: memref<1x144xf32, #tpu.memory_space<vmem>>, %arg9: memref<1x144xf32, #tpu.memory_space<vmem>>, %arg10: memref<1x128xf32, #tpu.memory_space<vmem>>, %arg11: memref<1x128xf32, #tpu.memory_space<vmem>>, %arg12: memref<1x128xf32, #tpu.memory_space<vmem>>, %arg13: memref<144x32xbf16, #tpu.memory_space<vmem>>, %arg14: memref<1x352xf32, #tpu.memory_space<vmem>>, %arg15: memref<1x352xf32, #tpu.memory_space<vmem>>, %arg16: memref<1x320xf32, #tpu.memory_space<vmem>>, %arg17: memref<1x320xf32, #tpu.memory_space<vmem>>, %arg18: memref<1x320xf32, #tpu.memory_space<vmem>>, %arg19: memref<1x288xf32, #tpu.memory_space<vmem>>, %arg20: memref<1x288xf32, #tpu.memory_space<vmem>>, %arg21: memref<1x288xf32, #tpu.memory_space<vmem>>, %arg22: memref<1x256xf32, #tpu.memory_space<vmem>>, %arg23: memref<1x256xf32, #tpu.memory_space<vmem>>, %arg24: memref<1x256xf32, #tpu.memory_space<vmem>>, %arg25: memref<288x128xbf16, #tpu.memory_space<vmem>>, %arg26: memref<8x128xf32, #tpu.memory_space<vmem>>) attributes {dimension_semantics = [#tpu.dimension_semantics<parallel>], iteration_bounds = array<i64: 1>, scalar_prefetch = 0 : i64, scratch_operands = 0 : i64, tpu.core_type = #tpu.core_type<tc>, window_params = [{transform_indices = @transform_0, window_bounds = array<i64: 8, 16>}, {pipeline_mode = #tpu.pipeline_mode<synchronous>, transform_indices = @transform_1, window_bounds = array<i64: 1, 176>}, {pipeline_mode = #tpu.pipeline_mode<synchronous>, transform_indices = @transform_2, window_bounds = array<i64: 1, 176>}, {pipeline_mode = #tpu.pipeline_mode<synchronous>, transform_indices = @transform_3, window_bounds = array<i64: 1, 160>}, {pipeline_mode = #tpu.pipeline_mode<synchronous>, transform_indices = @transform_4, window_bounds = array<i64: 1, 160>}, {pipeline_mode = #tpu.pipeline_mode<synchronous>, transform_indices = @transform_5, window_bounds = array<i64: 1, 160>}, {pipeline_mode = #tpu.pipeline_mode<synchronous>, transform_indices = @transform_6, window_bounds = array<i64: 1, 144>}, {pipeline_mode = #tpu.pipeline_mode<synchronous>, transform_indices = @transform_7, window_bounds = array<i64: 1, 144>}, {pipeline_mode = #tpu.pipeline_mode<synchronous>, transform_indices = @transform_8, window_bounds = array<i64: 1, 144>}, {pipeline_mode = #tpu.pipeline_mode<synchronous>, transform_indices = @transform_9, window_bounds = array<i64: 1, 128>}, {pipeline_mode = #tpu.pipeline_mode<synchronous>, transform_indices = @transform_10, window_bounds = array<i64: 1, 128>}, {pipeline_mode = #tpu.pipeline_mode<synchronous>, transform_indices = @transform_11, window_bounds = array<i64: 1, 128>}, {pipeline_mode = #tpu.pipeline_mode<synchronous>, transform_indices = @transform_12, window_bounds = array<i64: 144, 32>}, {pipeline_mode = #tpu.pipeline_mode<synchronous>, transform_indices = @transform_13, window_bounds = array<i64: 1, 352>}, {pipeline_mode = #tpu.pipeline_mode<synchronous>, transform_indices = @transform_14, window_bounds = array<i64: 1, 352>}, {pipeline_mode = #tpu.pipeline_mode<synchronous>, transform_indices = @transform_15, window_bounds = array<i64: 1, 320>}, {pipeline_mode = #tpu.pipeline_mode<synchronous>, transform_indices = @transform_16, window_bounds = array<i64: 1, 320>}, {pipeline_mode = #tpu.pipeline_mode<synchronous>, transform_indices = @transform_17, window_bounds = array<i64: 1, 320>}, {pipeline_mode = #tpu.pipeline_mode<synchronous>, transform_indices = @transform_18, window_bounds = array<i64: 1, 288>}, {pipeline_mode = #tpu.pipeline_mode<synchronous>, transform_indices = @transform_19, window_bounds = array<i64: 1, 288>}, {pipeline_mode = #tpu.pipeline_mode<synchronous>, transform_indices = @transform_20, window_bounds = array<i64: 1, 288>}, {pipeline_mode = #tpu.pipeline_mode<synchronous>, transform_indices = @transform_21, window_bounds = array<i64: 1, 256>}, {pipeline_mode = #tpu.pipeline_mode<synchronous>, transform_indices = @transform_22, window_bounds = array<i64: 1, 256>}, {pipeline_mode = #tpu.pipeline_mode<synchronous>, transform_indices = @transform_23, window_bounds = array<i64: 1, 256>}, {pipeline_mode = #tpu.pipeline_mode<synchronous>, transform_indices = @transform_24, window_bounds = array<i64: 288, 128>}, {transform_indices = @transform_25, window_bounds = array<i64: 8, 128>}]} {
    %c0 = arith.constant 0 : index
    %c0_0 = arith.constant 0 : index
    %0 = vector.load %arg1[%c0, %c0_0] : memref<8x16xf32, #tpu.memory_space<vmem>>, vector<8x16xf32>
    %c0_1 = arith.constant 0 : index
    %c0_2 = arith.constant 0 : index
    %1 = vector.load %arg2[%c0_1, %c0_2] : memref<1x176xf32, #tpu.memory_space<vmem>>, vector<1x176xf32>
    %c0_3 = arith.constant 0 : index
    %c0_4 = arith.constant 0 : index
    %2 = vector.load %arg3[%c0_3, %c0_4] : memref<1x176xf32, #tpu.memory_space<vmem>>, vector<1x176xf32>
    %cst = arith.constant 5.000000e-01 : f32
    %3 = vector.broadcast %cst : f32 to vector<8x16xf32>
    %4 = arith.mulf %3, %0 : vector<8x16xf32>
    %5 = math.tanh %4 : vector<8x16xf32>
    %cst_5 = arith.constant 5.000000e-01 : f32
    %6 = vector.broadcast %cst_5 : f32 to vector<8x16xf32>
    %7 = arith.mulf %6, %5 : vector<8x16xf32>
    %cst_6 = arith.constant 5.000000e-01 : f32
    %8 = vector.broadcast %cst_6 : f32 to vector<8x16xf32>
    %9 = arith.addf %7, %8 : vector<8x16xf32>
    %10 = arith.mulf %0, %9 : vector<8x16xf32>
    %11 = tpu.concatenate %0, %0 in 1 : vector<8x16xf32>, vector<8x16xf32> -> vector<8x32xf32>
    %12 = tpu.concatenate %11, %11 in 1 : vector<8x32xf32>, vector<8x32xf32> -> vector<8x64xf32>
    %13 = tpu.concatenate %12, %12 in 1 : vector<8x64xf32>, vector<8x64xf32> -> vector<8x128xf32>
    %14 = vector.extract_strided_slice %13 {offsets = [0, 0], sizes = [8, 48], strides = [1, 1]} : vector<8x128xf32> to vector<8x48xf32>
    %15 = tpu.concatenate %13, %14 in 1 : vector<8x128xf32>, vector<8x48xf32> -> vector<8x176xf32>
    %16 = vector.broadcast %1 : vector<1x176xf32> to vector<8x176xf32>
    %17 = arith.cmpf oge, %15, %16 : vector<8x176xf32>
    %18 = vector.broadcast %2 : vector<1x176xf32> to vector<8x176xf32>
    %19 = arith.cmpf olt, %15, %18 : vector<8x176xf32>
    %20 = arith.andi %17, %19 : vector<8x176xi1>
    %cst_7 = arith.constant 1.000000e+00 : f32
    %cst_8 = arith.constant 0.000000e+00 : f32
    %21 = vector.broadcast %cst_7 : f32 to vector<8x176xf32>
    %22 = vector.broadcast %cst_8 : f32 to vector<8x176xf32>
    %23 = arith.select %20, %21, %22 : vector<8x176xi1>, vector<8x176xf32>
    %c0_9 = arith.constant 0 : index
    %c0_10 = arith.constant 0 : index
    %24 = vector.load %arg4[%c0_9, %c0_10] : memref<1x160xf32, #tpu.memory_space<vmem>>, vector<1x160xf32>
    %c0_11 = arith.constant 0 : index
    %c0_12 = arith.constant 0 : index
    %25 = vector.load %arg5[%c0_11, %c0_12] : memref<1x160xf32, #tpu.memory_space<vmem>>, vector<1x160xf32>
    %c0_13 = arith.constant 0 : index
    %c0_14 = arith.constant 0 : index
    %26 = vector.load %arg6[%c0_13, %c0_14] : memref<1x160xf32, #tpu.memory_space<vmem>>, vector<1x160xf32>
    %27 = vector.extract_strided_slice %15 {offsets = [0, 0], sizes = [8, 160], strides = [1, 1]} : vector<8x176xf32> to vector<8x160xf32>
    %28 = vector.extract_strided_slice %1 {offsets = [0, 0], sizes = [1, 160], strides = [1, 1]} : vector<1x176xf32> to vector<1x160xf32>
    %29 = vector.broadcast %28 : vector<1x160xf32> to vector<8x160xf32>
    %30 = arith.subf %27, %29 : vector<8x160xf32>
    %31 = vector.broadcast %25 : vector<1x160xf32> to vector<8x160xf32>
    %32 = arith.mulf %30, %31 : vector<8x160xf32>
    %33 = vector.extract_strided_slice %23 {offsets = [0, 0], sizes = [8, 160], strides = [1, 1]} : vector<8x176xf32> to vector<8x160xf32>
    %34 = arith.mulf %32, %33 : vector<8x160xf32>
    %35 = vector.broadcast %24 : vector<1x160xf32> to vector<8x160xf32>
    %36 = arith.subf %35, %27 : vector<8x160xf32>
    %37 = vector.broadcast %26 : vector<1x160xf32> to vector<8x160xf32>
    %38 = arith.mulf %36, %37 : vector<8x160xf32>
    %39 = vector.extract_strided_slice %23 {offsets = [0, 16], sizes = [8, 160], strides = [1, 1]} : vector<8x176xf32> to vector<8x160xf32>
    %40 = arith.mulf %38, %39 : vector<8x160xf32>
    %41 = arith.addf %34, %40 : vector<8x160xf32>
    %c0_15 = arith.constant 0 : index
    %c0_16 = arith.constant 0 : index
    %42 = vector.load %arg7[%c0_15, %c0_16] : memref<1x144xf32, #tpu.memory_space<vmem>>, vector<1x144xf32>
    %c0_17 = arith.constant 0 : index
    %c0_18 = arith.constant 0 : index
    %43 = vector.load %arg8[%c0_17, %c0_18] : memref<1x144xf32, #tpu.memory_space<vmem>>, vector<1x144xf32>
    %c0_19 = arith.constant 0 : index
    %c0_20 = arith.constant 0 : index
    %44 = vector.load %arg9[%c0_19, %c0_20] : memref<1x144xf32, #tpu.memory_space<vmem>>, vector<1x144xf32>
    %45 = vector.extract_strided_slice %15 {offsets = [0, 0], sizes = [8, 144], strides = [1, 1]} : vector<8x176xf32> to vector<8x144xf32>
    %46 = vector.extract_strided_slice %1 {offsets = [0, 0], sizes = [1, 144], strides = [1, 1]} : vector<1x176xf32> to vector<1x144xf32>
    %47 = vector.broadcast %46 : vector<1x144xf32> to vector<8x144xf32>
    %48 = arith.subf %45, %47 : vector<8x144xf32>
    %49 = vector.broadcast %43 : vector<1x144xf32> to vector<8x144xf32>
    %50 = arith.mulf %48, %49 : vector<8x144xf32>
    %51 = vector.extract_strided_slice %41 {offsets = [0, 0], sizes = [8, 144], strides = [1, 1]} : vector<8x160xf32> to vector<8x144xf32>
    %52 = arith.mulf %50, %51 : vector<8x144xf32>
    %53 = vector.broadcast %42 : vector<1x144xf32> to vector<8x144xf32>
    %54 = arith.subf %53, %45 : vector<8x144xf32>
    %55 = vector.broadcast %44 : vector<1x144xf32> to vector<8x144xf32>
    %56 = arith.mulf %54, %55 : vector<8x144xf32>
    %57 = vector.extract_strided_slice %41 {offsets = [0, 16], sizes = [8, 144], strides = [1, 1]} : vector<8x160xf32> to vector<8x144xf32>
    %58 = arith.mulf %56, %57 : vector<8x144xf32>
    %59 = arith.addf %52, %58 : vector<8x144xf32>
    %c0_21 = arith.constant 0 : index
    %c0_22 = arith.constant 0 : index
    %60 = vector.load %arg10[%c0_21, %c0_22] : memref<1x128xf32, #tpu.memory_space<vmem>>, vector<1x128xf32>
    %c0_23 = arith.constant 0 : index
    %c0_24 = arith.constant 0 : index
    %61 = vector.load %arg11[%c0_23, %c0_24] : memref<1x128xf32, #tpu.memory_space<vmem>>, vector<1x128xf32>
    %c0_25 = arith.constant 0 : index
    %c0_26 = arith.constant 0 : index
    %62 = vector.load %arg12[%c0_25, %c0_26] : memref<1x128xf32, #tpu.memory_space<vmem>>, vector<1x128xf32>
    %63 = vector.extract_strided_slice %15 {offsets = [0, 0], sizes = [8, 128], strides = [1, 1]} : vector<8x176xf32> to vector<8x128xf32>
    %64 = vector.extract_strided_slice %1 {offsets = [0, 0], sizes = [1, 128], strides = [1, 1]} : vector<1x176xf32> to vector<1x128xf32>
    %65 = vector.broadcast %64 : vector<1x128xf32> to vector<8x128xf32>
    %66 = arith.subf %63, %65 : vector<8x128xf32>
    %67 = vector.broadcast %61 : vector<1x128xf32> to vector<8x128xf32>
    %68 = arith.mulf %66, %67 : vector<8x128xf32>
    %69 = vector.extract_strided_slice %59 {offsets = [0, 0], sizes = [8, 128], strides = [1, 1]} : vector<8x144xf32> to vector<8x128xf32>
    %70 = arith.mulf %68, %69 : vector<8x128xf32>
    %71 = vector.broadcast %60 : vector<1x128xf32> to vector<8x128xf32>
    %72 = arith.subf %71, %63 : vector<8x128xf32>
    %73 = vector.broadcast %62 : vector<1x128xf32> to vector<8x128xf32>
    %74 = arith.mulf %72, %73 : vector<8x128xf32>
    %75 = vector.extract_strided_slice %59 {offsets = [0, 16], sizes = [8, 128], strides = [1, 1]} : vector<8x144xf32> to vector<8x128xf32>
    %76 = arith.mulf %74, %75 : vector<8x128xf32>
    %77 = arith.addf %70, %76 : vector<8x128xf32>
    %78 = tpu.concatenate %77, %10 in 1 : vector<8x128xf32>, vector<8x16xf32> -> vector<8x144xf32>
    %79 = arith.truncf %78 : vector<8x144xf32> to vector<8x144xbf16>
    %c0_27 = arith.constant 0 : index
    %c0_28 = arith.constant 0 : index
    %80 = vector.load %arg13[%c0_27, %c0_28] : memref<144x32xbf16, #tpu.memory_space<vmem>>, vector<144x32xbf16>
    %cst_29 = arith.constant dense<0.000000e+00> : vector<8x32xf32>
    %81 = tpu.matmul %79, %80, %cst_29 {dimension_numbers = #tpu.dot_dimension_numbers<[1], [0], [0], [1], [0, 0, 1, 1], [], []>} : vector<8x144xbf16>, vector<144x32xbf16>, vector<8x32xf32> -> vector<8x32xf32>
    %c0_30 = arith.constant 0 : index
    %c0_31 = arith.constant 0 : index
    %82 = vector.load %arg14[%c0_30, %c0_31] : memref<1x352xf32, #tpu.memory_space<vmem>>, vector<1x352xf32>
    %c0_32 = arith.constant 0 : index
    %c0_33 = arith.constant 0 : index
    %83 = vector.load %arg15[%c0_32, %c0_33] : memref<1x352xf32, #tpu.memory_space<vmem>>, vector<1x352xf32>
    %cst_34 = arith.constant 5.000000e-01 : f32
    %84 = vector.broadcast %cst_34 : f32 to vector<8x32xf32>
    %85 = arith.mulf %84, %81 : vector<8x32xf32>
    %86 = math.tanh %85 : vector<8x32xf32>
    %cst_35 = arith.constant 5.000000e-01 : f32
    %87 = vector.broadcast %cst_35 : f32 to vector<8x32xf32>
    %88 = arith.mulf %87, %86 : vector<8x32xf32>
    %cst_36 = arith.constant 5.000000e-01 : f32
    %89 = vector.broadcast %cst_36 : f32 to vector<8x32xf32>
    %90 = arith.addf %88, %89 : vector<8x32xf32>
    %91 = arith.mulf %81, %90 : vector<8x32xf32>
    %92 = tpu.concatenate %81, %81 in 1 : vector<8x32xf32>, vector<8x32xf32> -> vector<8x64xf32>
    %93 = tpu.concatenate %92, %92 in 1 : vector<8x64xf32>, vector<8x64xf32> -> vector<8x128xf32>
    %94 = tpu.concatenate %93, %93 in 1 : vector<8x128xf32>, vector<8x128xf32> -> vector<8x256xf32>
    %95 = vector.extract_strided_slice %94 {offsets = [0, 0], sizes = [8, 96], strides = [1, 1]} : vector<8x256xf32> to vector<8x96xf32>
    %96 = tpu.concatenate %94, %95 in 1 : vector<8x256xf32>, vector<8x96xf32> -> vector<8x352xf32>
    %97 = vector.broadcast %82 : vector<1x352xf32> to vector<8x352xf32>
    %98 = arith.cmpf oge, %96, %97 : vector<8x352xf32>
    %99 = vector.broadcast %83 : vector<1x352xf32> to vector<8x352xf32>
    %100 = arith.cmpf olt, %96, %99 : vector<8x352xf32>
    %101 = arith.andi %98, %100 : vector<8x352xi1>
    %cst_37 = arith.constant 1.000000e+00 : f32
    %cst_38 = arith.constant 0.000000e+00 : f32
    %102 = vector.broadcast %cst_37 : f32 to vector<8x352xf32>
    %103 = vector.broadcast %cst_38 : f32 to vector<8x352xf32>
    %104 = arith.select %101, %102, %103 : vector<8x352xi1>, vector<8x352xf32>
    %c0_39 = arith.constant 0 : index
    %c0_40 = arith.constant 0 : index
    %105 = vector.load %arg16[%c0_39, %c0_40] : memref<1x320xf32, #tpu.memory_space<vmem>>, vector<1x320xf32>
    %c0_41 = arith.constant 0 : index
    %c0_42 = arith.constant 0 : index
    %106 = vector.load %arg17[%c0_41, %c0_42] : memref<1x320xf32, #tpu.memory_space<vmem>>, vector<1x320xf32>
    %c0_43 = arith.constant 0 : index
    %c0_44 = arith.constant 0 : index
    %107 = vector.load %arg18[%c0_43, %c0_44] : memref<1x320xf32, #tpu.memory_space<vmem>>, vector<1x320xf32>
    %108 = vector.extract_strided_slice %96 {offsets = [0, 0], sizes = [8, 320], strides = [1, 1]} : vector<8x352xf32> to vector<8x320xf32>
    %109 = vector.extract_strided_slice %82 {offsets = [0, 0], sizes = [1, 320], strides = [1, 1]} : vector<1x352xf32> to vector<1x320xf32>
    %110 = vector.broadcast %109 : vector<1x320xf32> to vector<8x320xf32>
    %111 = arith.subf %108, %110 : vector<8x320xf32>
    %112 = vector.broadcast %106 : vector<1x320xf32> to vector<8x320xf32>
    %113 = arith.mulf %111, %112 : vector<8x320xf32>
    %114 = vector.extract_strided_slice %104 {offsets = [0, 0], sizes = [8, 320], strides = [1, 1]} : vector<8x352xf32> to vector<8x320xf32>
    %115 = arith.mulf %113, %114 : vector<8x320xf32>
    %116 = vector.broadcast %105 : vector<1x320xf32> to vector<8x320xf32>
    %117 = arith.subf %116, %108 : vector<8x320xf32>
    %118 = vector.broadcast %107 : vector<1x320xf32> to vector<8x320xf32>
    %119 = arith.mulf %117, %118 : vector<8x320xf32>
    %120 = vector.extract_strided_slice %104 {offsets = [0, 32], sizes = [8, 320], strides = [1, 1]} : vector<8x352xf32> to vector<8x320xf32>
    %121 = arith.mulf %119, %120 : vector<8x320xf32>
    %122 = arith.addf %115, %121 : vector<8x320xf32>
    %c0_45 = arith.constant 0 : index
    %c0_46 = arith.constant 0 : index
    %123 = vector.load %arg19[%c0_45, %c0_46] : memref<1x288xf32, #tpu.memory_space<vmem>>, vector<1x288xf32>
    %c0_47 = arith.constant 0 : index
    %c0_48 = arith.constant 0 : index
    %124 = vector.load %arg20[%c0_47, %c0_48] : memref<1x288xf32, #tpu.memory_space<vmem>>, vector<1x288xf32>
    %c0_49 = arith.constant 0 : index
    %c0_50 = arith.constant 0 : index
    %125 = vector.load %arg21[%c0_49, %c0_50] : memref<1x288xf32, #tpu.memory_space<vmem>>, vector<1x288xf32>
    %126 = vector.extract_strided_slice %96 {offsets = [0, 0], sizes = [8, 288], strides = [1, 1]} : vector<8x352xf32> to vector<8x288xf32>
    %127 = vector.extract_strided_slice %82 {offsets = [0, 0], sizes = [1, 288], strides = [1, 1]} : vector<1x352xf32> to vector<1x288xf32>
    %128 = vector.broadcast %127 : vector<1x288xf32> to vector<8x288xf32>
    %129 = arith.subf %126, %128 : vector<8x288xf32>
    %130 = vector.broadcast %124 : vector<1x288xf32> to vector<8x288xf32>
    %131 = arith.mulf %129, %130 : vector<8x288xf32>
    %132 = vector.extract_strided_slice %122 {offsets = [0, 0], sizes = [8, 288], strides = [1, 1]} : vector<8x320xf32> to vector<8x288xf32>
    %133 = arith.mulf %131, %132 : vector<8x288xf32>
    %134 = vector.broadcast %123 : vector<1x288xf32> to vector<8x288xf32>
    %135 = arith.subf %134, %126 : vector<8x288xf32>
    %136 = vector.broadcast %125 : vector<1x288xf32> to vector<8x288xf32>
    %137 = arith.mulf %135, %136 : vector<8x288xf32>
    %138 = vector.extract_strided_slice %122 {offsets = [0, 32], sizes = [8, 288], strides = [1, 1]} : vector<8x320xf32> to vector<8x288xf32>
    %139 = arith.mulf %137, %138 : vector<8x288xf32>
    %140 = arith.addf %133, %139 : vector<8x288xf32>
    %c0_51 = arith.constant 0 : index
    %c0_52 = arith.constant 0 : index
    %141 = vector.load %arg22[%c0_51, %c0_52] : memref<1x256xf32, #tpu.memory_space<vmem>>, vector<1x256xf32>
    %c0_53 = arith.constant 0 : index
    %c0_54 = arith.constant 0 : index
    %142 = vector.load %arg23[%c0_53, %c0_54] : memref<1x256xf32, #tpu.memory_space<vmem>>, vector<1x256xf32>
    %c0_55 = arith.constant 0 : index
    %c0_56 = arith.constant 0 : index
    %143 = vector.load %arg24[%c0_55, %c0_56] : memref<1x256xf32, #tpu.memory_space<vmem>>, vector<1x256xf32>
    %144 = vector.extract_strided_slice %96 {offsets = [0, 0], sizes = [8, 256], strides = [1, 1]} : vector<8x352xf32> to vector<8x256xf32>
    %145 = vector.extract_strided_slice %82 {offsets = [0, 0], sizes = [1, 256], strides = [1, 1]} : vector<1x352xf32> to vector<1x256xf32>
    %146 = vector.broadcast %145 : vector<1x256xf32> to vector<8x256xf32>
    %147 = arith.subf %144, %146 : vector<8x256xf32>
    %148 = vector.broadcast %142 : vector<1x256xf32> to vector<8x256xf32>
    %149 = arith.mulf %147, %148 : vector<8x256xf32>
    %150 = vector.extract_strided_slice %140 {offsets = [0, 0], sizes = [8, 256], strides = [1, 1]} : vector<8x288xf32> to vector<8x256xf32>
    %151 = arith.mulf %149, %150 : vector<8x256xf32>
    %152 = vector.broadcast %141 : vector<1x256xf32> to vector<8x256xf32>
    %153 = arith.subf %152, %144 : vector<8x256xf32>
    %154 = vector.broadcast %143 : vector<1x256xf32> to vector<8x256xf32>
    %155 = arith.mulf %153, %154 : vector<8x256xf32>
    %156 = vector.extract_strided_slice %140 {offsets = [0, 32], sizes = [8, 256], strides = [1, 1]} : vector<8x288xf32> to vector<8x256xf32>
    %157 = arith.mulf %155, %156 : vector<8x256xf32>
    %158 = arith.addf %151, %157 : vector<8x256xf32>
    %159 = tpu.concatenate %158, %91 in 1 : vector<8x256xf32>, vector<8x32xf32> -> vector<8x288xf32>
    %160 = arith.truncf %159 : vector<8x288xf32> to vector<8x288xbf16>
    %c0_57 = arith.constant 0 : index
    %c0_58 = arith.constant 0 : index
    %161 = vector.load %arg25[%c0_57, %c0_58] : memref<288x128xbf16, #tpu.memory_space<vmem>>, vector<288x128xbf16>
    %cst_59 = arith.constant dense<0.000000e+00> : vector<8x128xf32>
    %162 = tpu.matmul %160, %161, %cst_59 {dimension_numbers = #tpu.dot_dimension_numbers<[1], [0], [0], [1], [0, 0, 1, 1], [], []>} : vector<8x288xbf16>, vector<288x128xbf16>, vector<8x128xf32> -> vector<8x128xf32>
    %c0_60 = arith.constant 0 : index
    %c0_61 = arith.constant 0 : index
    %163 = vector.load %arg26[%c0_60, %c0_61] : memref<8x128xf32, #tpu.memory_space<vmem>>, vector<8x128xf32>
    tpu.vector_store %arg26[%c0_60, %c0_61], %162 {strides = array<i32>} : memref<8x128xf32, #tpu.memory_space<vmem>>, vector<8x128xf32>,
    return
  }
  func.func @transform_0(%arg0: i32) -> (i32, i32) {
    %c0_i32 = arith.constant 0 : i32
    %c0_i32_0 = arith.constant 0 : i32
    return %arg0, %c0_i32 : i32, i32
  }
  func.func @transform_1(%arg0: i32) -> (i32, i32) {
    %c0_i32 = arith.constant 0 : i32
    %c0_i32_0 = arith.constant 0 : i32
    %c0_i32_1 = arith.constant 0 : i32
    return %c0_i32, %c0_i32_0 : i32, i32
  }
  func.func @transform_2(%arg0: i32) -> (i32, i32) {
    %c0_i32 = arith.constant 0 : i32
    %c0_i32_0 = arith.constant 0 : i32
    %c0_i32_1 = arith.constant 0 : i32
    return %c0_i32, %c0_i32_0 : i32, i32
  }
  func.func @transform_3(%arg0: i32) -> (i32, i32) {
    %c0_i32 = arith.constant 0 : i32
    %c0_i32_0 = arith.constant 0 : i32
    %c0_i32_1 = arith.constant 0 : i32
    return %c0_i32, %c0_i32_0 : i32, i32
  }
  func.func @transform_4(%arg0: i32) -> (i32, i32) {
    %c0_i32 = arith.constant 0 : i32
    %c0_i32_0 = arith.constant 0 : i32
    %c0_i32_1 = arith.constant 0 : i32
    return %c0_i32, %c0_i32_0 : i32, i32
  }
  func.func @transform_5(%arg0: i32) -> (i32, i32) {
    %c0_i32 = arith.constant 0 : i32
    %c0_i32_0 = arith.constant 0 : i32
    %c0_i32_1 = arith.constant 0 : i32
    return %c0_i32, %c0_i32_0 : i32, i32
  }
  func.func @transform_6(%arg0: i32) -> (i32, i32) {
    %c0_i32 = arith.constant 0 : i32
    %c0_i32_0 = arith.constant 0 : i32
    %c0_i32_1 = arith.constant 0 : i32
    return %c0_i32, %c0_i32_0 : i32, i32
  }
  func.func @transform_7(%arg0: i32) -> (i32, i32) {
    %c0_i32 = arith.constant 0 : i32
    %c0_i32_0 = arith.constant 0 : i32
    %c0_i32_1 = arith.constant 0 : i32
    return %c0_i32, %c0_i32_0 : i32, i32
  }
  func.func @transform_8(%arg0: i32) -> (i32, i32) {
    %c0_i32 = arith.constant 0 : i32
    %c0_i32_0 = arith.constant 0 : i32
    %c0_i32_1 = arith.constant 0 : i32
    return %c0_i32, %c0_i32_0 : i32, i32
  }
  func.func @transform_9(%arg0: i32) -> (i32, i32) {
    %c0_i32 = arith.constant 0 : i32
    %c0_i32_0 = arith.constant 0 : i32
    %c0_i32_1 = arith.constant 0 : i32
    return %c0_i32, %c0_i32_0 : i32, i32
  }
  func.func @transform_10(%arg0: i32) -> (i32, i32) {
    %c0_i32 = arith.constant 0 : i32
    %c0_i32_0 = arith.constant 0 : i32
    %c0_i32_1 = arith.constant 0 : i32
    return %c0_i32, %c0_i32_0 : i32, i32
  }
  func.func @transform_11(%arg0: i32) -> (i32, i32) {
    %c0_i32 = arith.constant 0 : i32
    %c0_i32_0 = arith.constant 0 : i32
    %c0_i32_1 = arith.constant 0 : i32
    return %c0_i32, %c0_i32_0 : i32, i32
  }
  func.func @transform_12(%arg0: i32) -> (i32, i32) {
    %c0_i32 = arith.constant 0 : i32
    %c0_i32_0 = arith.constant 0 : i32
    %c0_i32_1 = arith.constant 0 : i32
    return %c0_i32, %c0_i32_0 : i32, i32
  }
  func.func @transform_13(%arg0: i32) -> (i32, i32) {
    %c0_i32 = arith.constant 0 : i32
    %c0_i32_0 = arith.constant 0 : i32
    %c0_i32_1 = arith.constant 0 : i32
    return %c0_i32, %c0_i32_0 : i32, i32
  }
  func.func @transform_14(%arg0: i32) -> (i32, i32) {
    %c0_i32 = arith.constant 0 : i32
    %c0_i32_0 = arith.constant 0 : i32
    %c0_i32_1 = arith.constant 0 : i32
    return %c0_i32, %c0_i32_0 : i32, i32
  }
  func.func @transform_15(%arg0: i32) -> (i32, i32) {
    %c0_i32 = arith.constant 0 : i32
    %c0_i32_0 = arith.constant 0 : i32
    %c0_i32_1 = arith.constant 0 : i32
    return %c0_i32, %c0_i32_0 : i32, i32
  }
  func.func @transform_16(%arg0: i32) -> (i32, i32) {
    %c0_i32 = arith.constant 0 : i32
    %c0_i32_0 = arith.constant 0 : i32
    %c0_i32_1 = arith.constant 0 : i32
    return %c0_i32, %c0_i32_0 : i32, i32
  }
  func.func @transform_17(%arg0: i32) -> (i32, i32) {
    %c0_i32 = arith.constant 0 : i32
    %c0_i32_0 = arith.constant 0 : i32
    %c0_i32_1 = arith.constant 0 : i32
    return %c0_i32, %c0_i32_0 : i32, i32
  }
  func.func @transform_18(%arg0: i32) -> (i32, i32) {
    %c0_i32 = arith.constant 0 : i32
    %c0_i32_0 = arith.constant 0 : i32
    %c0_i32_1 = arith.constant 0 : i32
    return %c0_i32, %c0_i32_0 : i32, i32
  }
  func.func @transform_19(%arg0: i32) -> (i32, i32) {
    %c0_i32 = arith.constant 0 : i32
    %c0_i32_0 = arith.constant 0 : i32
    %c0_i32_1 = arith.constant 0 : i32
    return %c0_i32, %c0_i32_0 : i32, i32
  }
  func.func @transform_20(%arg0: i32) -> (i32, i32) {
    %c0_i32 = arith.constant 0 : i32
    %c0_i32_0 = arith.constant 0 : i32
    %c0_i32_1 = arith.constant 0 : i32
    return %c0_i32, %c0_i32_0 : i32, i32
  }
  func.func @transform_21(%arg0: i32) -> (i32, i32) {
    %c0_i32 = arith.constant 0 : i32
    %c0_i32_0 = arith.constant 0 : i32
    %c0_i32_1 = arith.constant 0 : i32
    return %c0_i32, %c0_i32_0 : i32, i32
  }
  func.func @transform_22(%arg0: i32) -> (i32, i32) {
    %c0_i32 = arith.constant 0 : i32
    %c0_i32_0 = arith.constant 0 : i32
    %c0_i32_1 = arith.constant 0 : i32
    return %c0_i32, %c0_i32_0 : i32, i32
  }
  func.func @transform_23(%arg0: i32) -> (i32, i32) {
    %c0_i32 = arith.constant 0 : i32
    %c0_i32_0 = arith.constant 0 : i32
    %c0_i32_1 = arith.constant 0 : i32
    return %c0_i32, %c0_i32_0 : i32, i32
  }
  func.func @transform_24(%arg0: i32) -> (i32, i32) {
    %c0_i32 = arith.constant 0 : i32
    %c0_i32_0 = arith.constant 0 : i32
    %c0_i32_1 = arith.constant 0 : i32
    return %c0_i32, %c0_i32_0 : i32, i32
  }
  func.func @transform_25(%arg0: i32) -> (i32, i32) {
    %c0_i32 = arith.constant 0 : i32
    %c0_i32_0 = arith.constant 0 : i32
    return %arg0, %c0_i32 : i32, i32
  }
}

</mosaic_0001>

<bundles_post_ra>
// kernel: tpu_custom_call.1
= control target key start
LH: loop header
LB: loop body
LE: loop exit
PB: predicated region body
PF: predicated region fallthrough
CT: control target
= control target key end

     0   :  { %s2317_s0 = inlined_call_operand.hbm [shape: f32[8,16], index: 0, kind: input, shape index: {}]   ;;  %s2318_s1 = inlined_call_operand.hbm [shape: f32[1,176], index: 1, kind: input, shape index: {}]   ;;  %s2319_s2 = inlined_call_operand.hbm [shape: f32[1,176], index: 2, kind: input, shape index: {}]   ;;  %s2320_s3 = inlined_call_operand.hbm [shape: f32[1,160], index: 3, kind: input, shape index: {}]   ;;  %s2321_s4 = inlined_call_operand.hbm [shape: f32[1,160], index: 4, kind: input, shape index: {}]   ;;  %s2322_s5 = inlined_call_operand.hbm [shape: f32[1,160], index: 5, kind: input, shape index: {}]   ;;  %s2323_s6 = inlined_call_operand.hbm [shape: f32[1,144], index: 6, kind: input, shape index: {}]   ;;  %s2324_s7 = inlined_call_operand.hbm [shape: f32[1,144], index: 7, kind: input, shape index: {}]   ;;  %s2325_s8 = inlined_call_operand.hbm [shape: f32[1,144], index: 8, kind: input, shape index: {}]   ;;  %s2326_s9 = inlined_call_operand.hbm [shape: f32[1,128], index: 9, kind: input, shape index: {}]   ;;  %s2327_s10 = inlined_call_operand.hbm [shape: f32[1,128], index: 10, kind: input, shape index: {}]   ;;  %s2328_s11 = inlined_call_operand.hbm [shape: f32[1,128], index: 11, kind: input, shape index: {}]   ;;  %s2329_s12 = inlined_call_operand.vmem [shape: bf16[144,32], index: 12, kind: input, shape index: {}]   ;;  %s2330_s13 = inlined_call_operand.vmem [shape: f32[1,352], index: 13, kind: input, shape index: {}]   ;;  %s2331_s14 = inlined_call_operand.hbm [shape: f32[1,352], index: 14, kind: input, shape index: {}]   ;;  %s2332_s15 = inlined_call_operand.hbm [shape: f32[1,320], index: 15, kind: input, shape index: {}]   ;;  %s2333_s16 = inlined_call_operand.hbm [shape: f32[1,320], index: 16, kind: input, shape index: {}]   ;;  %s2334_s17 = inlined_call_operand.hbm [shape: f32[1,320], index: 17, kind: input, shape index: {}]   ;;  %s2335_s18 = inlined_call_operand.hbm [shape: f32[1,288], index: 18, kind: input, shape index: {}]   ;;  %s2336_s19 = inlined_call_operand.hbm [shape: f32[1,288], index: 19, kind: input, shape index: {}]   ;;  %s2337_s20 = inlined_call_operand.hbm [shape: f32[1,288], index: 20, kind: input, shape index: {}]   ;;  %s2338_s21 = inlined_call_operand.hbm [shape: f32[1,256], index: 21, kind: input, shape index: {}]   ;;  %s2339_s22 = inlined_call_operand.hbm [shape: f32[1,256], index: 22, kind: input, shape index: {}]   ;;  %s2340_s23 = inlined_call_operand.hbm [shape: f32[1,256], index: 23, kind: input, shape index: {}]   ;;  %s2341_s24 = inlined_call_operand.vmem [shape: bf16[288,128], index: 24, kind: input, shape index: {}]   ;;  %s2342_s25 = inlined_call_operand.hbm [shape: f32[8,128], index: 25, kind: output, shape index: {}]  }
   0x1   :  { %2343 = sst [smem:[#allocation51_spill]] %s2317_s0 }
   0x2   :  { %2344 = sst [smem:[#allocation52_spill]] %s2318_s1 }
   0x3   :  { %2345 = sst [smem:[#allocation53_spill]] %s2319_s2 }
   0x4   :  { %2346 = sst [smem:[#allocation54_spill]] %s2320_s3 }
   0x5   :  { %2347 = sst [smem:[#allocation55_spill]] %s2321_s4 }
   0x6   :  { %2348 = sst [smem:[#allocation56_spill]] %s2322_s5 }
   0x7   :  { %2349 = sst [smem:[#allocation57_spill]] %s2323_s6 }
   0x8   :  { %2350 = sst [smem:[#allocation58_spill]] %s2324_s7 }
   0x9   :  { %2351 = sst [smem:[#allocation59_spill]] %s2325_s8 }
   0xa   :  { %2352 = sst [smem:[#allocation60_spill]] %s2326_s9 }
   0xb   :  { %30 = vsyncpa [#allocation3], 0 }
   0xc   :  { %31 = vsyncpa [#allocation6], 0 }
   0xd   :  { %32 = vsyncpa [#allocation9], 0 }
   0xe   :  { %33 = vsyncpa [#allocation12], 0 }
   0xf   :  { %34 = vsyncpa [#allocation15], 0 }
  0x10   :  { %35 = vsyncpa [#allocation18], 0 }
  0x11   :  { %36 = vsyncpa [#allocation21], 0 }
  0x12   :  { %37 = vsyncpa [#allocation24], 0 }
  0x13   :  { %38 = vsyncpa [#allocation27], 0 }
  0x14   :  { %39 = vsyncpa [#allocation30], 0 }
  0x15   :  { %40 = vsyncpa [#allocation33], 0 }
  0x16   :  { %41 = vsyncpa [#allocation36], 0 }
  0x17   :  { %42 = vsyncpa [#allocation4], 0  ;;  %s1833_s29 = smov [#allocation5]   ;;  %s1834_s6 = smov [#allocation8]  }
  0x18   :  { %s59_s2 = sshll.u32 %s1833_s29, 4  ;;  %s79_s30 = sshll.u32 %s1834_s6, 4  ;;  %s60_s2 = int_to_ptr.vmem [resolvable:$true] %s59_s2  ;;  %s80_s30 = int_to_ptr.vmem [resolvable:$true] %s79_s30 }
  0x19   :  { %s1355_s7 = scalar_lea.vmem %s60_s2, 32  ;;  %p1360_p1 = scmp.lt.s32.totalorder %s60_s2, %s60_s2 }
  0x1a   :  { %p1356_p0 = scmp.ne.s32.totalorder %s60_s2, %s1355_s7  ;;  %p1361_p2 = scmp.lt.s32.totalorder %s1355_s7, %s1355_s7 }
  0x1c   :  { %p1362_p3 = por %p1361_p2, %p1360_p1 }
  0x1e   :  { %p1363_p4 = pnand %p1362_p3, %p1356_p0 }
  0x20   :  { %1366 = shalt.err (!%p1363_p4)
}
  0x21   :  { %s2353_s1 = sld [smem:[#allocation52_spill]]  ;;  %s1375_s8 = scalar_lea.vmem %s80_s30, 32 }
  0x22   :  { %p1376_p5 = scmp.ne.s32.totalorder %s80_s30, %s1375_s8  ;;  %p1380_p6 = scmp.lt.s32.totalorder %s80_s30, %s80_s30 }
  0x23   :  { %p1381_p7 = scmp.lt.s32.totalorder %s1375_s8, %s1375_s8 }
  0x25   :  { %p1382_p8 = por %p1381_p7, %p1380_p6 }
  0x27   :  { %62 = dma.hbm_to_vmem [thread:$0]  %s2353_s1, 32, %s60_s2, [#allocation6]  }
  0x28   :  { %p1383_p9 = pnand %p1382_p8, %p1376_p5 }
  0x2a   :  { %1386 = shalt.err (!%p1383_p9)
}
  0x2b   :  { %s2354_s28 = sld [smem:[#allocation54_spill]]  ;;  %s1835_s9 = smov [#allocation11]  }
  0x2c   :  { %s99_s5 = sshll.u32 %s1835_s9, 4  ;;  %s1836_s0 = smov [#allocation14]   ;;  %s100_s5 = int_to_ptr.vmem [resolvable:$true] %s99_s5 }
  0x2d   :  { %s119_s29 = sshll.u32 %s1836_s0, 4  ;;  %s1395_s6 = scalar_lea.vmem %s100_s5, 32  ;;  %s120_s29 = int_to_ptr.vmem [resolvable:$true] %s119_s29 }
  0x2e   :  { %p1396_p10 = scmp.ne.s32.totalorder %s100_s5, %s1395_s6  ;;  %p1400_p11 = scmp.lt.s32.totalorder %s100_s5, %s100_s5 }
  0x2f   :  { %p1401_p12 = scmp.lt.s32.totalorder %s1395_s6, %s1395_s6 }
  0x31   :  { %82 = dma.hbm_to_vmem [thread:$0]  %s2354_s28, 32, %s80_s30, [#allocation9]  }
  0x32   :  { %p1402_p13 = por %p1401_p12, %p1400_p11 }
  0x34   :  { %p1403_p0 = pnand %p1402_p13, %p1396_p10 }
  0x36   :  { %1406 = shalt.err (!%p1403_p0)
}
  0x37   :  { %s2355_s3 = sld [smem:[#allocation56_spill]]  ;;  %s1415_s26 = scalar_lea.vmem %s120_s29, 32 }
  0x38   :  { %p1416_p1 = scmp.ne.s32.totalorder %s120_s29, %s1415_s26  ;;  %p1420_p2 = scmp.lt.s32.totalorder %s120_s29, %s120_s29 }
  0x39   :  { %p1421_p3 = scmp.lt.s32.totalorder %s1415_s26, %s1415_s26 }
  0x3b   :  { %p1422_p4 = por %p1421_p3, %p1420_p2 }
  0x3d   :  { %102 = dma.hbm_to_vmem [thread:$0]  %s2355_s3, 32, %s100_s5, [#allocation12]  }
  0x3e   :  { %p1423_p5 = pnand %p1422_p4, %p1416_p1 }
  0x40   :  { %1426 = shalt.err (!%p1423_p5)
}
  0x41   :  { %s2356_s8 = sld [smem:[#allocation58_spill]]  ;;  %s1837_s27 = smov [#allocation17]  }
  0x42   :  { %s139_s4 = sshll.u32 %s1837_s27, 4  ;;  %s1838_s28 = smov [#allocation20]   ;;  %s140_s4 = int_to_ptr.vmem [resolvable:$true] %s139_s4 }
  0x43   :  { %s159_s9 = sshll.u32 %s1838_s28, 4  ;;  %s1435_s0 = scalar_lea.vmem %s140_s4, 16  ;;  %s160_s9 = int_to_ptr.vmem [resolvable:$true] %s159_s9 }
  0x44   :  { %p1436_p6 = scmp.ne.s32.totalorder %s140_s4, %s1435_s0  ;;  %s1439_s5 = scalar_lea.vmem %s140_s4, 32 }
  0x45   :  { %p1440_p7 = scmp.lt.s32.totalorder %s140_s4, %s140_s4  ;;  %p1441_p8 = scmp.lt.s32.totalorder %s1439_s5, %s1435_s0 }
  0x47   :  { %122 = dma.hbm_to_vmem [thread:$0]  %s2356_s8, 32, %s120_s29, [#allocation15]  }
  0x48   :  { %p1442_p9 = por %p1441_p8, %p1440_p7 }
  0x4a   :  { %p1443_p10 = pnand %p1442_p9, %p1436_p6 }
  0x4c   :  { %1446 = shalt.err (!%p1443_p10)
}
  0x4d   :  { %s2357_s7 = sld [smem:[#allocation60_spill]]  ;;  %s1455_s3 = scalar_lea.vmem %s160_s9, 16 }
  0x4e   :  { %p1456_p11 = scmp.ne.s32.totalorder %s160_s9, %s1455_s3  ;;  %s1459_s29 = scalar_lea.vmem %s160_s9, 32 }
  0x4f   :  { %p1460_p12 = scmp.lt.s32.totalorder %s160_s9, %s160_s9  ;;  %p1461_p13 = scmp.lt.s32.totalorder %s1459_s29, %s1455_s3 }
  0x51   :  { %p1462_p0 = por %p1461_p13, %p1460_p12 }
  0x53   :  { %142 = dma.hbm_to_vmem [thread:$0]  %s2357_s7, 16, %s140_s4, [#allocation18]  }
  0x54   :  { %p1463_p1 = pnand %p1462_p0, %p1456_p11 }
  0x56   :  { %1466 = shalt.err (!%p1463_p1)
}
  0x57   :  { %162 = dma.hbm_to_vmem [thread:$0]  %s2328_s11, 16, %s160_s9, [#allocation21]  }
  0x58   :  { %s1839_s1 = smov [#allocation23]   ;;  %s1840_s27 = smov [#allocation26]  }
  0x59   :  { %s183_s8 = sshll.u32 %s1839_s1, 4  ;;  %s203_s28 = sshll.u32 %s1840_s27, 4  ;;  %s184_s8 = int_to_ptr.vmem [resolvable:$true] %s183_s8  ;;  %s204_s28 = int_to_ptr.vmem [resolvable:$true] %s203_s28 }
  0x5a   :  { %s1475_s0 = scalar_lea.vmem %s184_s8, 48  ;;  %s1479_s4 = scalar_lea.vmem %s184_s8, 64 }
  0x5b   :  { %p1476_p2 = scmp.ne.s32.totalorder %s184_s8, %s1475_s0  ;;  %p1480_p3 = scmp.lt.s32.totalorder %s184_s8, %s184_s8 }
  0x5c   :  { %p1481_p4 = scmp.lt.s32.totalorder %s1479_s4, %s1475_s0 }
  0x5e   :  { %p1482_p5 = por %p1481_p4, %p1480_p3 }
  0x60   :  { %p1483_p6 = pnand %p1482_p5, %p1476_p2 }
  0x62   :  { %1486 = shalt.err (!%p1483_p6)
}
  0x63   :  { %186 = dma.hbm_to_vmem [thread:$0]  %s2332_s15, 48, %s184_s8, [#allocation24]  }
  0x64   :  { %s1495_s2 = scalar_lea.vmem %s204_s28, 48  ;;  %s1499_s11 = scalar_lea.vmem %s204_s28, 64 }
  0x65   :  { %p1496_p7 = scmp.ne.s32.totalorder %s204_s28, %s1495_s2  ;;  %p1500_p8 = scmp.lt.s32.totalorder %s204_s28, %s204_s28 }
  0x66   :  { %p1501_p9 = scmp.lt.s32.totalorder %s1499_s11, %s1495_s2 }
  0x68   :  { %p1502_p10 = por %p1501_p9, %p1500_p8 }
  0x6a   :  { %p1503_p11 = pnand %p1502_p10, %p1496_p7 }
  0x6c   :  { %1506 = shalt.err (!%p1503_p11)
}
  0x6d   :  { %206 = dma.hbm_to_vmem [thread:$0]  %s2334_s17, 48, %s204_s28, [#allocation27]  }
  0x6e   :  { %s1841_s3 = smov [#allocation29]   ;;  %s1842_s26 = smov [#allocation32]  }
  0x6f   :  { %s223_s29 = sshll.u32 %s1841_s3, 4  ;;  %s243_s30 = sshll.u32 %s1842_s26, 4  ;;  %s224_s29 = int_to_ptr.vmem [resolvable:$true] %s223_s29  ;;  %s244_s30 = int_to_ptr.vmem [resolvable:$true] %s243_s30 }
  0x70   :  { %s1515_s1 = scalar_lea.vmem %s224_s29, 48  ;;  %s1519_s15 = scalar_lea.vmem %s224_s29, 64 }
  0x71   :  { %p1516_p12 = scmp.ne.s32.totalorder %s224_s29, %s1515_s1  ;;  %p1520_p13 = scmp.lt.s32.totalorder %s224_s29, %s224_s29 }
  0x72   :  { %p1521_p0 = scmp.lt.s32.totalorder %s1519_s15, %s1515_s1 }
  0x74   :  { %p1522_p1 = por %p1521_p0, %p1520_p13 }
  0x76   :  { %p1523_p2 = pnand %p1522_p1, %p1516_p12 }
  0x78   :  { %1526 = shalt.err (!%p1523_p2)
}
  0x79   :  { %226 = dma.hbm_to_vmem [thread:$0]  %s2336_s19, 48, %s224_s29, [#allocation30]  }
  0x7a   :  { %s1535_s0 = scalar_lea.vmem %s244_s30, 32  ;;  %p1540_p4 = scmp.lt.s32.totalorder %s244_s30, %s244_s30 }
  0x7b   :  { %p1536_p3 = scmp.ne.s32.totalorder %s244_s30, %s1535_s0  ;;  %p1541_p5 = scmp.lt.s32.totalorder %s1535_s0, %s1535_s0 }
  0x7d   :  { %p1542_p6 = por %p1541_p5, %p1540_p4 }
  0x7f   :  { %p1543_p7 = pnand %p1542_p6, %p1536_p3 }
  0x81   :  { %1546 = shalt.err (!%p1543_p7)
}
  0x82   :  { %246 = dma.hbm_to_vmem [thread:$0]  %s2338_s21, 32, %s244_s30, [#allocation33]  }
  0x83   :  { %s1843_s4 = smov [#allocation2]   ;;  %s1844_s6 = smov [#allocation7]  }
  0x84   :  { %s49_s5 = sshll.u32 %s1843_s4, 4  ;;  %s69_s2 = sshll.u32 %s1844_s6, 4  ;;  %s50_s5 = int_to_ptr.vmem [resolvable:$true] %s49_s5  ;;  %s70_s2 = int_to_ptr.vmem [resolvable:$true] %s69_s2 }
  0x85   :  { %s1555_s11 = scalar_lea.vmem %s50_s5, 128  ;;  %p1560_p9 = scmp.lt.s32.totalorder %s50_s5, %s50_s5 }
  0x86   :  { %p1556_p8 = scmp.ne.s32.totalorder %s50_s5, %s1555_s11  ;;  %p1561_p10 = scmp.lt.s32.totalorder %s1555_s11, %s1555_s11 }
  0x88   :  { %p1562_p11 = por %p1561_p10, %p1560_p9 }
  0x8a   :  { %p1563_p12 = pnand %p1562_p11, %p1556_p8 }
  0x8c   :  { %1566 = shalt.err (!%p1563_p12)
}
  0x8d   :  { %s2358_s7 = sld [smem:[#allocation51_spill]]  ;;  %s1575_s3 = scalar_lea.vmem %s70_s2, 32 }
  0x8e   :  { %p1576_p13 = scmp.ne.s32.totalorder %s70_s2, %s1575_s3  ;;  %p1580_p0 = scmp.lt.s32.totalorder %s70_s2, %s70_s2 }
  0x8f   :  { %p1581_p1 = scmp.lt.s32.totalorder %s1575_s3, %s1575_s3 }
  0x91   :  { %p1582_p2 = por %p1581_p1, %p1580_p0 }
  0x93   :  { %52 = dma.hbm_to_vmem [thread:$0]  %s2358_s7, 128, %s50_s5, [#allocation3]  }
  0x94   :  { %p1583_p3 = pnand %p1582_p2, %p1576_p13 }
  0x96   :  { %1586 = shalt.err (!%p1583_p3)
}
  0x97   :  { %s2359_s26 = sld [smem:[#allocation53_spill]]  ;;  %s1845_s30 = smov [#allocation10]  }
  0x98   :  { %s89_s1 = sshll.u32 %s1845_s30, 4  ;;  %s1846_s15 = smov [#allocation13]   ;;  %s90_s1 = int_to_ptr.vmem [resolvable:$true] %s89_s1 }
  0x99   :  { %s109_s8 = sshll.u32 %s1846_s15, 4  ;;  %s1595_s27 = scalar_lea.vmem %s90_s1, 32  ;;  %s110_s8 = int_to_ptr.vmem [resolvable:$true] %s109_s8 }
  0x9a   :  { %p1596_p4 = scmp.ne.s32.totalorder %s90_s1, %s1595_s27  ;;  %p1600_p5 = scmp.lt.s32.totalorder %s90_s1, %s90_s1 }
  0x9b   :  { %p1601_p6 = scmp.lt.s32.totalorder %s1595_s27, %s1595_s27 }
  0x9d   :  { %72 = dma.hbm_to_vmem [thread:$0]  %s2359_s26, 32, %s70_s2, [#allocation6]  }
  0x9e   :  { %p1602_p7 = por %p1601_p6, %p1600_p5 }
  0xa0   :  { %p1603_p8 = pnand %p1602_p7, %p1596_p4 }
  0xa2   :  { %1606 = shalt.err (!%p1603_p8)
}
  0xa3   :  { %s2360_s28 = sld [smem:[#allocation55_spill]]  ;;  %s1615_s4 = scalar_lea.vmem %s110_s8, 32 }
  0xa4   :  { %p1616_p9 = scmp.ne.s32.totalorder %s110_s8, %s1615_s4  ;;  %p1620_p10 = scmp.lt.s32.totalorder %s110_s8, %s110_s8 }
  0xa5   :  { %p1621_p11 = scmp.lt.s32.totalorder %s1615_s4, %s1615_s4 }
  0xa7   :  { %p1622_p12 = por %p1621_p11, %p1620_p10 }
  0xa9   :  { %92 = dma.hbm_to_vmem [thread:$0]  %s2360_s28, 32, %s90_s1, [#allocation9]  }
  0xaa   :  { %p1623_p13 = pnand %p1622_p12, %p1616_p9 }
  0xac   :  { %1626 = shalt.err (!%p1623_p13)
}
  0xad   :  { %s2361_s2 = sld [smem:[#allocation57_spill]]  ;;  %s1847_s11 = smov [#allocation16]  }
  0xae   :  { %s129_s19 = sshll.u32 %s1847_s11, 4  ;;  %s1848_s9 = smov [#allocation19]   ;;  %s130_s19 = int_to_ptr.vmem [resolvable:$true] %s129_s19 }
  0xaf   :  { %s149_s7 = sshll.u32 %s1848_s9, 4  ;;  %s1635_s3 = scalar_lea.vmem %s130_s19, 32  ;;  %s150_s7 = int_to_ptr.vmem [resolvable:$true] %s149_s7 }
  0xb0   :  { %p1636_p0 = scmp.ne.s32.totalorder %s130_s19, %s1635_s3  ;;  %p1640_p1 = scmp.lt.s32.totalorder %s130_s19, %s130_s19 }
  0xb1   :  { %p1641_p2 = scmp.lt.s32.totalorder %s1635_s3, %s1635_s3 }
  0xb3   :  { %112 = dma.hbm_to_vmem [thread:$0]  %s2361_s2, 32, %s110_s8, [#allocation12]  }
  0xb4   :  { %p1642_p3 = por %p1641_p2, %p1640_p1 }
  0xb6   :  { %p1643_p4 = pnand %p1642_p3, %p1636_p0 }
  0xb8   :  { %1646 = shalt.err (!%p1643_p4)
}
  0xb9   :  { %s2362_s26 = sld [smem:[#allocation59_spill]]  ;;  %s1655_s30 = scalar_lea.vmem %s150_s7, 16 }
  0xba   :  { %p1656_p5 = scmp.ne.s32.totalorder %s150_s7, %s1655_s30  ;;  %s1659_s1 = scalar_lea.vmem %s150_s7, 32 }
  0xbb   :  { %p1660_p6 = scmp.lt.s32.totalorder %s150_s7, %s150_s7  ;;  %p1661_p7 = scmp.lt.s32.totalorder %s1659_s1, %s1655_s30 }
  0xbd   :  { %p1662_p8 = por %p1661_p7, %p1660_p6 }
  0xbf   :  { %132 = dma.hbm_to_vmem [thread:$0]  %s2362_s26, 32, %s130_s19, [#allocation15]  }
  0xc0   :  { %p1663_p9 = pnand %p1662_p8, %p1656_p5 }
  0xc2   :  { %1666 = shalt.err (!%p1663_p9)
}
  0xc3   :  { %152 = dma.hbm_to_vmem [thread:$0]  %s2327_s10, 16, %s150_s7, [#allocation18]  }
  0xc4   :  { %s1849_s27 = smov [#allocation22]   ;;  %s1850_s17 = smov [#allocation25]  }
  0xc5   :  { %s173_s0 = sshll.u32 %s1849_s27, 4  ;;  %s193_s28 = sshll.u32 %s1850_s17, 4  ;;  %s174_s0 = int_to_ptr.vmem [resolvable:$true] %s173_s0  ;;  %s194_s28 = int_to_ptr.vmem [resolvable:$true] %s193_s28 }
  0xc6   :  { %s1675_s4 = scalar_lea.vmem %s174_s0, 48  ;;  %s1679_s5 = scalar_lea.vmem %s174_s0, 64 }
  0xc7   :  { %p1676_p10 = scmp.ne.s32.totalorder %s174_s0, %s1675_s4  ;;  %p1680_p11 = scmp.lt.s32.totalorder %s174_s0, %s174_s0 }
  0xc8   :  { %p1681_p12 = scmp.lt.s32.totalorder %s1679_s5, %s1675_s4 }
  0xca   :  { %p1682_p13 = por %p1681_p12, %p1680_p11 }
  0xcc   :  { %p1683_p0 = pnand %p1682_p13, %p1676_p10 }
  0xce   :  { %1686 = shalt.err (!%p1683_p0)
}
  0xcf   :  { %176 = dma.hbm_to_vmem [thread:$0]  %s2331_s14, 48, %s174_s0, [#allocation21]  }
  0xd0   :  { %s1695_s11 = scalar_lea.vmem %s194_s28, 48  ;;  %s1699_s10 = scalar_lea.vmem %s194_s28, 64 }
  0xd1   :  { %p1696_p1 = scmp.ne.s32.totalorder %s194_s28, %s1695_s11  ;;  %p1700_p2 = scmp.lt.s32.totalorder %s194_s28, %s194_s28 }
  0xd2   :  { %p1701_p3 = scmp.lt.s32.totalorder %s1699_s10, %s1695_s11 }
  0xd4   :  { %p1702_p4 = por %p1701_p3, %p1700_p2 }
  0xd6   :  { %p1703_p5 = pnand %p1702_p4, %p1696_p1 }
  0xd8   :  { %1706 = shalt.err (!%p1703_p5)
}
  0xd9   :  { %196 = dma.hbm_to_vmem [thread:$0]  %s2333_s16, 48, %s194_s28, [#allocation24]  }
  0xda   :  { %s1851_s7 = smov [#allocation28]   ;;  %s1852_s21 = smov [#allocation31]  }
  0xdb   :  { %s213_s3 = sshll.u32 %s1851_s7, 4  ;;  %s233_s29 = sshll.u32 %s1852_s21, 4  ;;  %s214_s3 = int_to_ptr.vmem [resolvable:$true] %s213_s3  ;;  %s234_s29 = int_to_ptr.vmem [resolvable:$true] %s233_s29 }
  0xdc   :  { %s1715_s26 = scalar_lea.vmem %s214_s3, 48  ;;  %s1719_s14 = scalar_lea.vmem %s214_s3, 64 }
  0xdd   :  { %p1716_p6 = scmp.ne.s32.totalorder %s214_s3, %s1715_s26  ;;  %p1720_p7 = scmp.lt.s32.totalorder %s214_s3, %s214_s3 }
  0xde   :  { %p1721_p8 = scmp.lt.s32.totalorder %s1719_s14, %s1715_s26 }
  0xe0   :  { %p1722_p9 = por %p1721_p8, %p1720_p7 }
  0xe2   :  { %p1723_p10 = pnand %p1722_p9, %p1716_p6 }
  0xe4   :  { %1726 = shalt.err (!%p1723_p10)
}
  0xe5   :  { %216 = dma.hbm_to_vmem [thread:$0]  %s2335_s18, 48, %s214_s3, [#allocation27]  }
  0xe6   :  { %s1735_s15 = scalar_lea.vmem %s234_s29, 48  ;;  %s1739_s16 = scalar_lea.vmem %s234_s29, 64 }
  0xe7   :  { %p1736_p11 = scmp.ne.s32.totalorder %s234_s29, %s1735_s15  ;;  %p1740_p12 = scmp.lt.s32.totalorder %s234_s29, %s234_s29 }
  0xe8   :  { %p1741_p13 = scmp.lt.s32.totalorder %s1739_s16, %s1735_s15 }
  0xea   :  { %p1742_p0 = por %p1741_p13, %p1740_p12 }
  0xec   :  { %p1743_p1 = pnand %p1742_p0, %p1736_p11 }
  0xee   :  { %1746 = shalt.err (!%p1743_p1)
}
  0xef   :  { %236 = dma.hbm_to_vmem [thread:$0]  %s2337_s20, 48, %s234_s29, [#allocation30]  }
  0xf0   :  { %s1853_s0 = smov [#allocation34]   ;;  %s1854_s28 = smov [#allocation35]  }
  0xf1   :  { %s253_s17 = sshll.u32 %s1853_s0, 4  ;;  %s263_s4 = sshll.u32 %s1854_s28, 4  ;;  %s254_s17 = int_to_ptr.vmem [resolvable:$true] %s253_s17  ;;  %s264_s4 = int_to_ptr.vmem [resolvable:$true] %s263_s4 }
  0xf2   :  { %s1755_s5 = scalar_lea.vmem %s254_s17, 32  ;;  %p1760_p3 = scmp.lt.s32.totalorder %s254_s17, %s254_s17 }
  0xf3   :  { %p1756_p2 = scmp.ne.s32.totalorder %s254_s17, %s1755_s5  ;;  %p1761_p4 = scmp.lt.s32.totalorder %s1755_s5, %s1755_s5 }
  0xf5   :  { %p1762_p5 = por %p1761_p4, %p1760_p3 }
  0xf7   :  { %p1763_p6 = pnand %p1762_p5, %p1756_p2 }
  0xf9   :  { %1766 = shalt.err (!%p1763_p6)
}
  0xfa   :  { %256 = dma.hbm_to_vmem [thread:$0]  %s2339_s22, 32, %s254_s17, [#allocation33]  }
  0xfb   :  { %s1775_s2 = scalar_lea.vmem %s264_s4, 32  ;;  %p1780_p8 = scmp.lt.s32.totalorder %s264_s4, %s264_s4 }
  0xfc   :  { %p1776_p7 = scmp.ne.s32.totalorder %s264_s4, %s1775_s2  ;;  %p1781_p9 = scmp.lt.s32.totalorder %s1775_s2, %s1775_s2 }
  0xfe   :  { %p1782_p10 = por %p1781_p9, %p1780_p8 }
 0x100   :  { %p1783_p11 = pnand %p1782_p10, %p1776_p7 }
 0x102   :  { %1786 = shalt.err (!%p1783_p11)
}
 0x103   :  { %266 = dma.hbm_to_vmem [thread:$0]  %s2340_s23, 32, %s264_s4, [#allocation36]  }
 0x104   :  { %1807 = dma.done.wait [#allocation3], 128  }
 0x105   :  { %1808 = vsyncadd [#allocation3], 4294967168 }
 0x106   :  { %1809 = dma.done.wait [#allocation6], 64  }
 0x107   :  { %1810 = vsyncadd [#allocation6], 4294967232 }
 0x108   :  { %1811 = dma.done.wait [#allocation9], 64  }
 0x109   :  { %1812 = vsyncadd [#allocation9], 4294967232 }
 0x10a   :  { %1813 = dma.done.wait [#allocation12], 64  }
 0x10b   :  { %1814 = vsyncadd [#allocation12], 4294967232 }
 0x10c   :  { %1815 = dma.done.wait [#allocation15], 64  }
 0x10d   :  { %1816 = vsyncadd [#allocation15], 4294967232 }
 0x10e   :  { %1817 = dma.done.wait [#allocation18], 32  }
 0x10f   :  { %1818 = vsyncadd [#allocation18], 4294967264 }
 0x110   :  { %1819 = dma.done.wait [#allocation21], 64  }
 0x111   :  { %1820 = vsyncadd [#allocation21], 4294967232 }
 0x112   :  { %1821 = dma.done.wait [#allocation24], 96  }
 0x113   :  { %1822 = vsyncadd [#allocation24], 4294967200 }
 0x114   :  { %1823 = dma.done.wait [#allocation27], 96  }
 0x115   :  { %1824 = vsyncadd [#allocation27], 4294967200 }
 0x116   :  { %1825 = dma.done.wait [#allocation30], 96  }
 0x117   :  { %1826 = vsyncadd [#allocation30], 4294967200 }
 0x118   :  { %1827 = dma.done.wait [#allocation33], 64  }
 0x119   :  { %1828 = vsyncadd [#allocation33], 4294967232 }
 0x11a   :  { %1829 = dma.done.wait [#allocation36], 32  }
 0x11b   :  { %1830 = vsyncadd [#allocation36], 4294967264  ;;  %v2060_v0 = vld [vmem:[#allocation2] sm:$0xff]  ;;  %s1855_s22 = smov 16   ;;  %vm348_vm0 = vcmask 130048   ;;  %s1856_s23 = smov 32   ;;  %v363_v5 = vlaneseq }
 0x11c   :  { %345 = vrot.lane.b32.xlu0 %v2060_v0, %s1855_s22  ;;  %vm354_vm1 = vcmask 261120   ;;  %s1857_s10 = smov 64   ;;  %v337_v9 = vld [vmem:[#allocation5] sm:$0x3]  ;;  %v338_v10 = vld [vmem:[#allocation7] sm:$0x3] }
 0x11d   :  { %v2068_v6 = vshrl.u32 %v363_v5, 7  ;;  %vm360_vm2 = vcmask 523264   ;;  %v393_v15 = vld [vmem:[#allocation10] sm:$0x3]  ;;  %v1858_v22 = vmov 0.0   ;;  %s1859_s19 = smov 112  }
 0x11e   :  { %v392_v30 = vld [vmem:[#allocation8] sm:$0x3]  ;;  %v394_v32 = vld [vmem:[#allocation11] sm:$0x3]  ;;  %v453_v38 = vld [vmem:[#allocation14] sm:$0x3] }
 0x11f   :  { %v2071_v7 = vsub.s32 0, %v2068_v6  ;;  %v2074_v8 = vsub.s32 1, %v2068_v6  ;;  %vm444_vm9 = vcmask 916480   ;;  %v1316_v40 = vld [vmem:[%s2329_s12 + $0x38] sm:$0xff]   ;;  %v1860_v45 = vmov 0   ;;  %v1317_v48 = vld [vmem:[%s2329_s12 + $0x30] sm:$0xff]  }
 0x120   :  { %621 = vmatprep.subr.bf16.mxu0 %v1860_v45  ;;  %v1318_v56 = vld [vmem:[%s2329_s12 + $0x28] sm:$0xff]   ;;  %v1319_v59 = vld [vmem:[%s2329_s12 + $0x20] sm:$0xff]   ;;  %v1320_v60 = vld [vmem:[%s2329_s12 + $0x18] sm:$0xff]   ;;  %v339_v63 = vmul.f32 0.5, %v2060_v0 }
 0x121   :  { %v366_v11 = vrot.slane %v337_v9, %v2071_v7  ;;  %v370_v12 = vrot.slane %v337_v9, %v2074_v8  ;;  %v379_v13 = vrot.slane %v338_v10, %v2071_v7  ;;  %v383_v14 = vrot.slane %v338_v10, %v2074_v8  ;;  %622 = vmatpush1.bf16.msra.mxu0 %v1316_v40  ;;  %v1321_v61 = vld [vmem:[%s2329_s12 + $0x10] sm:$0xff]   ;;  %v1322_v62 = vld [vmem:[%s2329_s12 + $0x8] sm:$0xff]  }
 0x122   :  { %v405_v18 = vrot.slane %v393_v15, %v2074_v8  ;;  %v401_v19 = vrot.slane %v393_v15, %v2071_v7  ;;  %v420_v31 = vrot.slane %v392_v30, %v2074_v8  ;;  %v416_v33 = vrot.slane %v392_v30, %v2071_v7  ;;  %623 = vmatprep.subr.bf16.mxu0 %v1860_v45  ;;  %v1324_v15 = vld [vmem:[%s2329_s12 + $0x40] sm:$0xff]  }
 0x123   :  { %v433_v35 = vrot.slane %v394_v32, %v2074_v8  ;;  %v429_v36 = vrot.slane %v394_v32, %v2071_v7  ;;  %v463_v44 = vrot.slane %v453_v38, %v2074_v8  ;;  %v459_v47 = vrot.slane %v453_v38, %v2071_v7 }
 0x124   :  { %1343 = vtanh.f32 %v339_v63 }
 0x125   :  { %624 = vmatpush1.bf16.msra.mxu0 %v1317_v48  ;;  %v662_v48 = vld [vmem:[#allocation22] sm:$0x7] }
 0x126   :  { %625 = vmatprep.subr.bf16.mxu0 %v1860_v45 }
 0x129   :  { %626 = vmatpush1.bf16.msra.mxu0 %v1318_v56 }
 0x12a   :  { %627 = vmatprep.subr.bf16.mxu0 %v1860_v45 }
 0x12d   :  { %628 = vmatpush1.bf16.msra.mxu0 %v1319_v59  ;;  %v705_v59 = vrot.slane %v662_v48, %v2074_v8 }
 0x12e   :  { %629 = vmatprep.subr.bf16.mxu0 %v1860_v45 }
 0x131   :  { %630 = vmatpush1.bf16.msra.mxu0 %v1320_v60  ;;  %v1344_v5 = vpop.eup %1343 }
 0x132   :  { %631 = vmatprep.subr.bf16.mxu0 %v1860_v45 }
 0x135   :  { %632 = vmatpush1.bf16.msra.mxu0 %v1321_v61 }
 0x136   :  { %633 = vmatprep.subr.bf16.mxu0 %v1860_v45 }
 0x139   :  { %634 = vmatpush1.bf16.msra.mxu0 %v1322_v62 }
 0x13a   :  { %635 = vmatprep.subr.bf16.mxu0 %v1860_v45 }
 0x18e   :  { %v346_v1 = vpop.permute.xlu0 %345 }
 0x18f   :  { %v349_v2 = vsel %vm348_vm0, %v2060_v0, %v346_v1  ;;  %v452_v1 = vld [vmem:[#allocation13] sm:$0x3] }
 0x190   :  { %351 = vrot.lane.b32.xlu0 %v349_v2, %s1856_s23 }
 0x202   :  { %v352_v3 = vpop.permute.xlu0 %351 }
 0x203   :  { %v355_v4 = vsel %vm354_vm1, %v349_v2, %v352_v3  ;;  %v478_v2 = vrot.slane %v452_v1, %v2074_v8  ;;  %v454_v3 = vld [vmem:[#allocation16] sm:$0x3] }
 0x204   :  { %357 = vrot.lane.b32.xlu1 %v355_v4, %s1857_s10  ;;  %v491_v10 = vrot.slane %v454_v3, %v2074_v8 }
 0x276   :  { %v358_v16 = vpop.permute.xlu1 %357 }
 0x277   :  { %v2081_v17 = vsel %vm360_vm2, %v355_v4, %v358_v16  ;;  %v474_v4 = vrot.slane %v452_v1, %v2071_v7 }
 0x278   :  { %vm373_vm3 = vcmp.ge.f32.partialorder %v2081_v17, %v366_v11  ;;  %vm374_vm4 = vcmp.ge.f32.partialorder %v2081_v17, %v370_v12  ;;  %vm386_vm5 = vcmp.lt.f32.partialorder %v2081_v17, %v379_v13  ;;  %vm387_vm6 = vcmp.lt.f32.partialorder %v2081_v17, %v383_v14 }
 0x279   :  { %vm388_vm7 = vmand %vm373_vm3, %vm386_vm5  ;;  %v2090_v20 = vsub.f32 %v2081_v17, %v366_v11  ;;  %v396_v21 = vsub.f32 %v2081_v17, %v370_v12  ;;  %v424_v34 = vsub.f32 %v420_v31, %v2081_v17  ;;  %v423_v37 = vsub.f32 %v416_v33, %v2081_v17  ;;  %v1323_v11 = vld [vmem:[%s2329_s12] sm:$0xff]   ;;  %v1211_v33 = vld [vmem:[#allocation17] ss:$0 sm:$0xff] }
 0x27a   :  { %vm389_vm8 = vmand %vm374_vm4, %vm387_vm6  ;;  %v390_v23 = vsel %vm388_vm7, 1.0, %v1858_v22  ;;  %v482_v9 = vsub.f32 %v478_v2, %v2081_v17  ;;  %v341_v12 = vmul.f32 0.5, %v1344_v5  ;;  %v481_v13 = vsub.f32 %v474_v4, %v2081_v17  ;;  %636 = vmatpush1.bf16.msra.mxu0 %v1323_v11 }
 0x27b   :  { %v391_v24 = vsel %vm389_vm8, 1.0, %v1858_v22  ;;  %v409_v25 = vmul.f32 %v405_v18, %v396_v21  ;;  %v408_v26 = vmul.f32 %v401_v19, %v2090_v20  ;;  %v437_v41 = vmul.f32 %v433_v35, %v424_v34  ;;  %651 = vmatprep.subr.bf16.mxu0 %v1860_v45  ;;  %v1212_v35 = vld [vmem:[#allocation20] ss:$0 sm:$0xff] }
 0x27c   :  { %v1306_v27 = vpack.i.bf16 %v391_v24, %v390_v23  ;;  %v436_v46 = vmul.f32 %v429_v36, %v423_v37  ;;  %v467_v53 = vmul.f32 %v463_v44, %v396_v21  ;;  %v466_v55 = vmul.f32 %v459_v47, %v2090_v20  ;;  %v661_v47 = vld [vmem:[%s2330_s13] sm:$0x7]  ;;  %s1861_s13 = smov 96  }
 0x27d   :  { %v411_v28 = vmul.f32 %v409_v25, %v391_v24  ;;  %v410_v29 = vmul.f32 %v408_v26, %v390_v23  ;;  %v487_v14 = vrot.slane %v454_v3, %v2071_v7  ;;  %v342_v16 = vadd.f32 0.5, %v341_v12 }
 0x27e   :  { %1307 = vrot.lane.b32.xlu1 %v1306_v27, %s1859_s19  ;;  %v495_v18 = vmul.f32 %v491_v10, %v482_v9  ;;  %652 = vmatpush2.bf16.msra.mxu0 %v1324_v15  ;;  %v526_v34 = vsub.f32 %v1211_v33, %v2081_v17  ;;  %v686_v56 = vrot.slane %v661_v47, %v2074_v8  ;;  %v2186_v10 = vld [vmem:[#allocation31] sm:$0x7]  ;;  %vm797_vm4 = vcmask 785408  }
 0x27f   :  { %v343_v19 = vmul.f32 %v342_v16, %v2060_v0  ;;  %v494_v24 = vmul.f32 %v487_v14, %v481_v13  ;;  %vm1862_vm5 = vmmov 0  }
 0x280   :  { %v533_v37 = vmul.f32 %v1212_v35, %v526_v34 }
 0x281   :  { %v545_v26 = vpack.c.bf16 %v343_v19, %v343_v19 }
 0x283   :  { %1222 = vmatprep.mubr.msk.bf16.mxu0 %vm348_vm0, %v545_v26 }
 0x2f0   :  { %v1308_v39 = vpop.permute.xlu1 %1307 }
 0x2f1   :  { %v1310_v42 = vunpack.i.h.bf16 %v1308_v39  ;;  %v1309_v43 = vunpack.i.l.bf16 %v1308_v39 }
 0x2f3   :  { %v449_v49 = vmul.f32 %v1310_v42, %v437_v41  ;;  %v445_v50 = vsel %vm444_vm9, %v1309_v43, %v1310_v42 }
 0x2f4   :  { %v448_v51 = vmul.f32 %v445_v50, %v436_v46  ;;  %v722_v50 = vld [vmem:[#allocation23] sm:$0x7] }
 0x2f5   :  { %v451_v52 = vadd.f32 %v449_v49, %v411_v28  ;;  %v1210_v28 = vld [vmem:[#allocation19] ss:$0 sm:$0xff]  ;;  %v689_v49 = vsub.s32 2, %v2068_v6 }
 0x2f6   :  { %v450_v54 = vadd.f32 %v448_v51, %v410_v29  ;;  %v518_v32 = vmul.f32 %v1210_v28, %v2090_v20  ;;  %v723_v51 = vld [vmem:[#allocation25] sm:$0x7] }
 0x2f7   :  { %500 = vrot.lane.b32.xlu1 %v451_v52, %s1859_s19  ;;  %v469_v57 = vmul.f32 %v467_v53, %v451_v52  ;;  %v2162_v52 = vld [vmem:[#allocation26] sm:$0x7]  ;;  %v2164_v53 = vld [vmem:[#allocation28] sm:$0x7]  ;;  %v709_v60 = vrot.slane %v662_v48, %v689_v49  ;;  %v732_v6 = vrot.slane %v723_v51, %v2071_v7  ;;  %v762_v62 = vrot.slane %v722_v50, %v689_v49 }
 0x2f8   :  { %498 = vrot.lane.b32.xlu0 %v450_v54, %s1859_s19  ;;  %v468_v58 = vmul.f32 %v466_v55, %v450_v54  ;;  %v682_v54 = vrot.slane %v661_v47, %v2071_v7  ;;  %v701_v55 = vrot.slane %v662_v48, %v2071_v7  ;;  %v781_v63 = vrot.slane %v2162_v52, %v689_v49 }
 0x2f9   :  { %v846_v1 = vrot.slane %v2164_v53, %v689_v49  ;;  %v740_v3 = vrot.slane %v723_v51, %v689_v49  ;;  %v736_v4 = vrot.slane %v723_v51, %v2074_v8  ;;  %v865_v19 = vrot.slane %v2186_v10, %v689_v49  ;;  %v1327_v51 = vld [vmem:[%s2341_s24 + $0x70] sm:$0xff]  }
 0x2fa   :  { %v777_v34 = vrot.slane %v2162_v52, %v2074_v8 }
 0x369   :  { %v501_v21 = vpop.permute.xlu1 %500 }
 0x36a   :  { %v506_v23 = vmul.f32 %v501_v21, %v495_v18  ;;  %v499_v25 = vpop.permute.xlu0 %498 }
 0x36b   :  { %v502_v27 = vsel %vm444_vm9, %v499_v25, %v501_v21 }
 0x36c   :  { %v508_v29 = vadd.f32 %v506_v23, %v469_v57  ;;  %v505_v30 = vmul.f32 %v502_v27, %v494_v24  ;;  %v2169_v57 = vld [vmem:[#allocation29] sm:$0x7] }
 0x36d   :  { %v824_v5 = vrot.slane %v2169_v57, %v689_v49 }
 0x36e   :  { %538 = vrot.lane.b32.xlu1 %v508_v29, %s1859_s19  ;;  %v507_v31 = vadd.f32 %v505_v30, %v468_v58  ;;  %v690_v58 = vrot.slane %v661_v47, %v689_v49  ;;  %v1325_v49 = vld [vmem:[%s2341_s24 + $0x78] sm:$0xff]  }
 0x36f   :  { %1242 = vmatprep.subr.bf16.mxu1 %v1325_v49 }
 0x370   :  { %536 = vrot.lane.b32.xlu0 %v507_v31, %s1859_s19  ;;  %v519_v0 = vmul.f32 %v518_v32, %v507_v31  ;;  %v758_v32 = vrot.slane %v722_v50, %v2074_v8  ;;  %s1863_s19 = smov [#allocation37]  }
 0x371   :  { %s1190_s9 = sshll.u32 %s1863_s19, 4  ;;  %s1191_s9 = int_to_ptr.vmem [resolvable:$true] %s1190_s9 }
 0x372   :  { %p1792_p13 = scmp.lt.s32.totalorder %s1191_s9, %s1191_s9 }
 0x3e0   :  { %v539_v36 = vpop.permute.xlu1 %538 }
 0x3e2   :  { %v537_v38 = vpop.permute.xlu0 %536 }
 0x3e3   :  { %v540_v39 = vsel %vm444_vm9, %v537_v38, %v539_v36  ;;  %v773_v36 = vrot.slane %v2162_v52, %v2071_v7 }
 0x3e4   :  { %v542_v40 = vmul.f32 %v540_v39, %v533_v37 }
 0x3e6   :  { %v543_v41 = vadd.f32 %v542_v40, %v519_v0  ;;  %v754_v0 = vrot.slane %v722_v50, %v2071_v7  ;;  %v1326_v50 = vld [vmem:[%s2341_s24 + $0x38] sm:$0xff]  }
 0x3e7   :  { %1243 = vmatpush3.bf16.msra.mxu1 %v1326_v50 }
 0x3e8   :  { %v544_v42 = vpack.c.bf16 %v543_v41, %v543_v41  ;;  %1244 = vmatprep.subr.bf16.mxu1 %v1327_v51 }
 0x3ea   :  { %654 = vmatmul.mubr.bf16.vlgmr.msra.gmra.mxu0 %v544_v42 }
 0x4aa   :  { %v2151_v43 = vpop.f32.mrf.mxu0 }
 0x4ab   :  { %669 = vrot.lane.b32.xlu0 %v2151_v43, %s1856_s23 }
 0x4ac   :  { %v657_v20 = vpop.f32.mrf.mxu0 }
 0x4ad   :  { %v820_v20 = vrot.slane %v2169_v57, %v2074_v8 }
 0x4ae   :  { %v658_v44 = vpop.f32.mrf.mxu0 }
 0x4af   :  { %v816_v44 = vrot.slane %v2169_v57, %v2071_v7 }
 0x4b0   :  { %v659_v45 = vpop.f32.mrf.mxu0 }
 0x51d   :  { %v670_v46 = vpop.permute.xlu0 %669 }
 0x51e   :  { %v672_v17 = vsel %vm354_vm1, %v2151_v43, %v670_v46 }
 0x51f   :  { %674 = vrot.lane.b32.xlu1 %v672_v17, %s1857_s10 }
 0x591   :  { %v675_v61 = vpop.permute.xlu1 %674 }
 0x592   :  { %v2176_v2 = vsel %vm360_vm2, %v672_v17, %v675_v61 }
 0x593   :  { %vm694_vm10 = vcmp.ge.f32.partialorder %v2176_v2, %v682_v54  ;;  %vm713_vm11 = vcmp.lt.f32.partialorder %v2176_v2, %v701_v55  ;;  %v2183_v9 = vsub.f32 %v2176_v2, %v682_v54  ;;  %vm695_vm12 = vcmp.ge.f32.partialorder %v2176_v2, %v686_v56 }
 0x594   :  { %vm716_vm13 = vmand %vm694_vm10, %vm713_vm11  ;;  %vm696_vm14 = vcmp.ge.f32.partialorder %v2176_v2, %v690_v58  ;;  %vm714_vm15 = vcmp.lt.f32.partialorder %v2176_v2, %v705_v59  ;;  %vm715_vm0 = vcmp.lt.f32.partialorder %v2176_v2, %v709_v60  ;;  %v2192_v11 = vsub.f32 %v2176_v2, %v686_v56  ;;  %v1328_v59 = vld [vmem:[%s2341_s24 + $0x30] sm:$0xff]  }
 0x595   :  { %v719_v12 = vsel %vm716_vm13, 1.0, %v1858_v22  ;;  %v744_v13 = vmul.f32 %v732_v6, %v2183_v9  ;;  %vm717_vm2 = vmand %vm695_vm12, %vm714_vm15  ;;  %v768_v14 = vsub.f32 %v762_v62, %v2176_v2  ;;  %v727_v15 = vsub.f32 %v2176_v2, %v690_v58  ;;  %v1329_v6 = vld [vmem:[%s2341_s24 + $0x68] sm:$0xff]   ;;  %1245 = vmatpush3.bf16.msra.mxu1 %v1328_v59 }
 0x596   :  { %791 = vrot.lane.b32.xlu1 %v719_v12, %s1861_s13  ;;  %vm718_vm3 = vmand %vm696_vm14, %vm715_vm0  ;;  %v720_v16 = vsel %vm717_vm2, 1.0, %v1858_v22  ;;  %v745_v18 = vmul.f32 %v736_v4, %v2192_v11  ;;  %v852_v30 = vsub.f32 %v846_v1, %v2176_v2  ;;  %v767_v33 = vsub.f32 %v758_v32, %v2176_v2  ;;  %v1330_v62 = vld [vmem:[%s2341_s24 + $0x28] sm:$0xff]   ;;  %1246 = vmatprep.subr.bf16.mxu1 %v1329_v6  ;;  %v1332_v1 = vld [vmem:[%s2341_s24 + $0x20] sm:$0xff]  }
 0x597   :  { %v747_v21 = vmul.f32 %v744_v13, %v719_v12  ;;  %v721_v23 = vsel %vm718_vm3, 1.0, %v1858_v22  ;;  %v787_v24 = vmul.f32 %v781_v63, %v768_v14  ;;  %v746_v25 = vmul.f32 %v740_v3, %v727_v15  ;;  %v1331_v63 = vld [vmem:[%s2341_s24 + $0x60] sm:$0xff]   ;;  %v1333_v3 = vld [vmem:[%s2341_s24 + $0x58] sm:$0xff]   ;;  %v1336_v12 = vld [vmem:[%s2341_s24 + $0x10] sm:$0xff]  }
 0x598   :  { %v1311_v26 = vpack.i.bf16 %v721_v23, %v720_v16  ;;  %v748_v27 = vmul.f32 %v745_v18, %v720_v16  ;;  %v830_v29 = vmul.f32 %v824_v5, %v727_v15  ;;  %v2205_v31 = vmul.f32 %v865_v19, %v852_v30  ;;  %v1334_v4 = vld [vmem:[%s2341_s24 + $0x18] sm:$0xff]   ;;  %v1335_v5 = vld [vmem:[%s2341_s24 + $0x50] sm:$0xff]   ;;  %v1337_v14 = vld [vmem:[%s2341_s24 + $0x48] sm:$0xff]  }
 0x599   :  { %v749_v28 = vmul.f32 %v746_v25, %v721_v23  ;;  %v766_v35 = vsub.f32 %v754_v0, %v2176_v2  ;;  %v786_v41 = vmul.f32 %v777_v34, %v767_v33  ;;  %v829_v56 = vmul.f32 %v820_v20, %v2192_v11  ;;  %1247 = vmatpush3.bf16.msra.mxu1 %v1330_v62  ;;  %v1338_v15 = vld [vmem:[%s2341_s24 + $0x8] sm:$0xff]   ;;  %v1339_v23 = vld [vmem:[%s2341_s24 + $0x40] sm:$0xff]  }
 0x59a   :  { %1312 = vrot.lane.b32.xlu0 %v1311_v26, %s1861_s13  ;;  %v828_v57 = vmul.f32 %v816_v44, %v2183_v9  ;;  %1248 = vmatprep.subr.bf16.mxu1 %v1331_v63  ;;  %v842_v13 = vrot.slane %v2164_v53, %v2074_v8  ;;  %v861_v18 = vrot.slane %v2186_v10, %v2074_v8  ;;  %v663_v20 = vmul.f32 0.5, %v2151_v43  ;;  %v892_v44 = vld [vmem:[#allocation32] sm:$0x3]  ;;  %v1342_v63 = vld [vmem:[%s2341_s24 + $0x80] sm:$0xff]  }
 0x59b   :  { %v785_v42 = vmul.f32 %v773_v36, %v766_v35  ;;  %v838_v19 = vrot.slane %v2164_v53, %v2071_v7  ;;  %v857_v26 = vrot.slane %v2186_v10, %v2071_v7 }
 0x59c   :  { %v851_v16 = vsub.f32 %v842_v13, %v2176_v2  ;;  %1345 = vtanh.f32 %v663_v20 }
 0x59d   :  { %1249 = vmatpush3.bf16.msra.mxu1 %v1332_v1  ;;  %v850_v53 = vsub.f32 %v838_v19, %v2176_v2 }
 0x59e   :  { %1250 = vmatprep.subr.bf16.mxu1 %v1333_v3 }
 0x59f   :  { %v869_v34 = vmul.f32 %v857_v26, %v850_v53 }
 0x5a1   :  { %1251 = vmatpush3.bf16.msra.mxu1 %v1334_v4 }
 0x5a2   :  { %1252 = vmatprep.subr.bf16.mxu1 %v1335_v5 }
 0x5a5   :  { %1253 = vmatpush3.bf16.msra.mxu1 %v1336_v12 }
 0x5a6   :  { %1254 = vmatprep.subr.bf16.mxu1 %v1337_v14 }
 0x5a9   :  { %1255 = vmatpush3.bf16.msra.mxu1 %v1338_v15 }
 0x5aa   :  { %1256 = vmatprep.subr.bf16.mxu1 %v1339_v23 }
 0x608   :  { %v792_v40 = vpop.permute.xlu1 %791 }
 0x60c   :  { %v1313_v37 = vpop.permute.xlu0 %1312 }
 0x60d   :  { %v1315_v38 = vunpack.i.h.bf16 %v1313_v37  ;;  %v1314_v39 = vunpack.i.l.bf16 %v1313_v37 }
 0x60f   :  { %v805_v45 = vmul.f32 %v1315_v38, %v787_v24  ;;  %v798_v46 = vsel %vm797_vm4, %v792_v40, %v1314_v39  ;;  %v799_v17 = vsel %vm797_vm4, %v1314_v39, %v1315_v38  ;;  %v1340_v24 = vld [vmem:[%s2341_s24] sm:$0xff]  }
 0x610   :  { %v804_v47 = vmul.f32 %v799_v17, %v786_v41  ;;  %v803_v48 = vmul.f32 %v798_v46, %v785_v42  ;;  %1257 = vmatpush3.bf16.msra.mxu1 %v1340_v24  ;;  %v894_v46 = vld [vmem:[#allocation35] sm:$0x3] }
 0x611   :  { %v808_v52 = vadd.f32 %v805_v45, %v749_v28  ;;  %v870_v28 = vmul.f32 %v861_v18, %v851_v16  ;;  %1267 = vmatprep.subr.bf16.mxu1 %v1858_v22  ;;  %v918_v45 = vrot.slane %v892_v44, %v2074_v8  ;;  %v927_v50 = vrot.slane %v894_v46, %v2071_v7 }
 0x612   :  { %v807_v54 = vadd.f32 %v804_v47, %v748_v27  ;;  %v806_v55 = vadd.f32 %v803_v48, %v747_v21  ;;  %v893_v21 = vld [vmem:[#allocation34] sm:$0x3]  ;;  %v931_v47 = vrot.slane %v894_v46, %v2074_v8 }
 0x613   :  { %879 = vrot.lane.b32.xlu1 %v808_v52, %s1861_s13  ;;  %v833_v58 = vmul.f32 %v830_v29, %v808_v52  ;;  %v903_v30 = vrot.slane %v893_v21, %v2074_v8  ;;  %v922_v17 = vsub.f32 %v918_v45, %v2176_v2 }
 0x614   :  { %877 = vrot.lane.b32.xlu0 %v807_v54, %s1861_s13  ;;  %v832_v60 = vmul.f32 %v829_v56, %v807_v54  ;;  %v831_v61 = vmul.f32 %v828_v57, %v806_v55 }
 0x615   :  { %v907_v36 = vmul.f32 %v903_v30, %v2192_v11  ;;  %v914_v11 = vrot.slane %v892_v44, %v2071_v7  ;;  %v935_v51 = vmul.f32 %v931_v47, %v922_v17 }
 0x618   :  { %875 = vrot.lane.b32.xlu0 %v806_v55, %s1861_s13  ;;  %v1346_v55 = vpop.eup %1345 }
 0x685   :  { %v880_v25 = vpop.permute.xlu1 %879 }
 0x686   :  { %v888_v27 = vmul.f32 %v880_v25, %v2205_v31  ;;  %v878_v29 = vpop.permute.xlu0 %877  ;;  %v899_v31 = vrot.slane %v893_v21, %v2071_v7 }
 0x687   :  { %v882_v32 = vsel %vm797_vm4, %v878_v29, %v880_v25 }
 0x688   :  { %v891_v0 = vadd.f32 %v888_v27, %v833_v58  ;;  %v887_v33 = vmul.f32 %v882_v32, %v870_v28  ;;  %v906_v41 = vmul.f32 %v899_v31, %v2183_v9  ;;  %v921_v9 = vsub.f32 %v914_v11, %v2176_v2  ;;  %v1341_v2 = vld [vmem:[%s2341_s24 + $0x88] sm:$0xff]   ;;  %s1787_s24 = scalar_lea.vmem %s1191_s9, 128 }
 0x689   :  { %p1788_p12 = scmp.ne.s32.totalorder %s1191_s9, %s1787_s24  ;;  %p1793_p0 = scmp.lt.s32.totalorder %s1787_s24, %s1787_s24 }
 0x68a   :  { %943 = vrot.lane.b32.xlu0 %v891_v0, %s1861_s13  ;;  %v876_v10 = vpop.permute.xlu0 %875  ;;  %v890_v35 = vadd.f32 %v887_v33, %v832_v60  ;;  %v934_v56 = vmul.f32 %v927_v50, %v921_v9  ;;  %v665_v60 = vmul.f32 0.5, %v1346_v55 }
 0x68b   :  { %v881_v37 = vsel %vm797_vm4, %v876_v10, %v878_v29  ;;  %p1794_p1 = por %p1793_p0, %p1792_p13 }
 0x68c   :  { %v886_v38 = vmul.f32 %v881_v37, %v869_v34  ;;  %941 = vrot.lane.b32.xlu1 %v890_v35, %s1861_s13  ;;  %v909_v39 = vmul.f32 %v907_v36, %v890_v35  ;;  %v666_v7 = vadd.f32 0.5, %v665_v60 }
 0x68d   :  { %p1795_p2 = pnand %p1794_p1, %p1788_p12 }
 0x68e   :  { %v889_v40 = vadd.f32 %v886_v38, %v831_v61  ;;  %v667_v1 = vmul.f32 %v666_v7, %v2151_v43 }
 0x690   :  { %939 = vrot.lane.b32.xlu1 %v889_v40, %s1861_s13  ;;  %v908_v42 = vmul.f32 %v906_v41, %v889_v40  ;;  %v955_v3 = vpack.c.bf16 %v667_v1, %v667_v1 }
 0x6fc   :  { %v944_v48 = vpop.permute.xlu0 %943 }
 0x6fe   :  { %v942_v49 = vpop.permute.xlu1 %941 }
 0x6ff   :  { %v946_v52 = vsel %vm797_vm4, %v942_v49, %v944_v48 }
 0x700   :  { %v950_v54 = vmul.f32 %v946_v52, %v935_v51 }
 0x702   :  { %v940_v57 = vpop.permute.xlu1 %939  ;;  %v952_v58 = vadd.f32 %v950_v54, %v909_v39 }
 0x703   :  { %v945_v59 = vsel %vm797_vm4, %v940_v57, %v942_v49 }
 0x704   :  { %v949_v61 = vmul.f32 %v945_v59, %v934_v56  ;;  %v954_v6 = vpack.c.bf16 %v952_v58, %v952_v58 }
 0x706   :  { %1135 = vmatprep.mubr.bf16.mxu1 %v954_v6  ;;  %v951_v8 = vadd.f32 %v949_v61, %v908_v42 }
 0x708   :  { %v953_v62 = vpack.c.bf16 %v951_v8, %v951_v8 }
 0x70a   :  { %1136 = vmatmul.mubr.bf16.vlgmr.msra.gmra.mxu1 %v953_v62 }
 0x70b   :  { %1268 = vmatpush3.bf16.msra.mxu1 %v1341_v2  ;;  %1271 = vmatprep.mubr.msk.bf16.mxu1 %vm1862_vm5, %v1858_v22 }
 0x70c   :  { %1269 = vmatprep.subr.bf16.mxu1 %v1858_v22 }
 0x70f   :  { %1270 = vmatpush3.bf16.msra.mxu1 %v1342_v63 }
 0x712   :  { %1272 = vmatmul.mubr.msk.bf16.vlgmr.msra.gmra.mxu1 %vm354_vm1, %v955_v3 }
 0x7ca   :  { %v1258_v4 = vpop.f32.mrf.mxu1 }
 0x7cc   :  { %v1259_v5 = vpop.f32.mrf.mxu1 }
 0x7cd   :  { %v1260_v14 = vadd.f32 %v1259_v5, %v1258_v4 }
 0x7ce   :  { %v1261_v12 = vpop.f32.mrf.mxu1 }
 0x7d0   :  { %v1262_v13 = vpop.f32.mrf.mxu1 }
 0x7d2   :  { %v1177_v15 = vpop.f32.mrf.mxu1 }
 0x7d3   :  { %v1178_v16 = vadd.f32 %v1260_v14, %v1177_v15 }
 0x7d4   :  { %v1273_v18 = vpop.f32.mrf.mxu1 }
 0x7d5   :  { %1183 = vst [vmem:[#allocation37] sm:$0xff] %v1178_v16 }
 0x7d6   :  { %v1180_v19 = vpop.f32.mrf.mxu1 }
 0x7d7   :  { %1798 = shalt.err (!%p1795_p2)
}
 0x7d8   :  { %1193 = dma.vmem_to_hbm [thread:$0]  %s1191_s9, 128, %s2342_s25, [#allocation4]   ;;  %v1274_v22 = vpop.f32.mrf.mxu1 }
 0x7d9   :  { %1831 = dma.done.wait [#allocation4], 128  }
 0x7da   :  { %1832 = vsyncadd [#allocation4], 4294967168 }
 0x7db   :  { %1197 = vsyncpa [#allocation3], 1 }
 0x7dc   :  { %1198 = vsyncpa [#allocation6], 1 }
 0x7dd   :  { %1199 = vsyncpa [#allocation9], 1 }
 0x7de   :  { %1200 = vsyncpa [#allocation12], 1 }
 0x7df   :  { %1201 = vsyncpa [#allocation15], 1 }
 0x7e0   :  { %1202 = vsyncpa [#allocation18], 1 }
 0x7e1   :  { %1203 = vsyncpa [#allocation21], 1 }
 0x7e2   :  { %1204 = vsyncpa [#allocation24], 1 }
 0x7e3   :  { %1205 = vsyncpa [#allocation27], 1 }
 0x7e4   :  { %1206 = vsyncpa [#allocation30], 1 }
 0x7e5   :  { %1207 = vsyncpa [#allocation33], 1 }
 0x7e6   :  { %1208 = vsyncpa [#allocation36], 1 }
 0x7e7   :  { %1209 = vsyncpa [#allocation4], 1 }

</bundles_post_ra>
